<compile_context>
chip_gen: v7x
topology: tpu7x:2x2x1
jax: 0.10.0
libtpu: 0.0.40
codegen_flags: <defaults>
</compile_context>

<pallas_src>
import functools

import jax
import jax.numpy as jnp
from jax.experimental import pallas as pl
from jax.experimental.pallas import tpu as pltpu


LANE = 128        # channels padded to a multiple of this (lane axis)
ROW_ALIGN = 16    # padded image width multiple (bf16 sublane packing = 16)


def _round_up(x, m):
    return (x + m - 1) // m * m


def _vmem_capacity_bytes():
    """Per-core VMEM capacity; conservative fallback works on every generation."""
    try:
        return int(pltpu.get_tpu_info().vmem_capacity_bytes)
    except Exception:
        return 64 * 1024 * 1024          # v7x per-TC size; safe lower bound


def _pick_tile_h(H, N, WP, cin_p, cout_p, budget_bytes):
    """Largest divisor of H whose per-step VMEM footprint fits the budget,
    while keeping >=2 grid steps when possible (pipelining + v7x megacore)."""
    def step_bytes(th):
        xb = 2 * (th + 4) * WP * cin_p * 2      # pipelined input block (bf16, x2)
        ob = 2 * th * WP * cout_p * 2           # pipelined output block (bf16, x2)
        h1 = (th + 2) * WP * cout_p * 2         # h1 scratch (bf16)
        a1 = (th + 2) * WP * cout_p * 4         # conv1 f32 accumulator
        a2 = th * WP * cout_p * 4               # conv2 f32 accumulator
        tmp = (th + 2) * WP * cout_p * 4        # rolled / partial f32 temporaries
        return xb + ob + h1 + a1 + a2 + tmp

    divs = [d for d in range(1, H + 1) if H % d == 0]
    fitting = [d for d in divs if step_bytes(d) <= budget_bytes] or [1]
    th = max(fitting)
    # Keep at least 2 grid steps (so the pipeline has something to overlap and
    # both v7x TensorCores get work) when the image allows it.
    if N * (H // th) < 2 or (N % 2 == 1 and (H // th) < 2):
        smaller = [d for d in fitting if (H // d) >= 2]
        if smaller:
            th = max(smaller)
    return th


# ------------------------------ kernel -------------------------------------


def _bottleneck_kernel(x_ref, w1_ref, s1_ref, b1_ref, w2_ref, s2_ref, b2_ref,
                       keep_ref, o_ref, h1_sc, *, W, WP, TH, shortcut):
    t = pl.program_id(1)
    R1 = TH + 2                 # h1 rows (1-row halo each side)
    M1 = R1 * WP                # flattened h1 rows
    M2 = TH * WP                # flattened output rows
    cout_p = o_ref.shape[-1]

    def conv3x3(src_ref, w_ref, m_out, base_shift):
        """3x3 conv over a flattened (rows*WP, C) strip.

        dy is handled by aligned row-slab ref slices; the dx column shift is a
        pltpu.roll (XLU) on the flattened sublane axis, so there are no
        misaligned slice/reshape relayouts."""
        cout = w_ref.shape[-1]
        acc = jnp.zeros((m_out, cout), jnp.float32)
        for dx in range(3):
            part = jnp.zeros((m_out, cout), jnp.float32)
            for dy in range(3):
                lhs = src_ref[dy * WP:dy * WP + m_out, :]       # aligned slab
                part = part + jnp.dot(lhs, w_ref[dy, dx],
                                      preferred_element_type=jnp.float32)
            s = base_shift - dx
            if s != 0:
                part = pltpu.roll(part, shift=s % m_out, axis=0)
            acc = acc + part
        return acc

    # ---- conv1 + BN(eval) + ReLU -> bf16 VMEM scratch (stays on chip) ----
    a1 = conv3x3(x_ref, w1_ref, M1, base_shift=1)    # output in padded-col coords
    h1 = jnp.maximum(a1 * s1_ref[...] + b1_ref[...], 0.0)
    # Width-pad columns of h1 act as conv2's zero padding -> precomputed mask.
    h1 = h1.reshape(R1, WP, cout_p) * keep_ref[...]
    h1_sc[...] = h1.reshape(M1, cout_p).astype(h1_sc.dtype)

    # Halo rows falling outside the image are conv2's zero padding too.
    @pl.when(t == 0)
    def _():
        h1_sc[0:WP, :] = jnp.zeros((WP, cout_p), h1_sc.dtype)

    @pl.when(t == pl.num_programs(1) - 1)
    def _():
        h1_sc[(R1 - 1) * WP:R1 * WP, :] = jnp.zeros((WP, cout_p), h1_sc.dtype)

    # ---- conv2 + BN(eval) + ReLU (+ residual) ----
    a2 = conv3x3(h1_sc, w2_ref, M2, base_shift=0)    # output in data-col coords
    y = jnp.maximum(a2 * s2_ref[...] + b2_ref[...], 0.0)
    if shortcut:
        res = x_ref[2 * WP:2 * WP + M2, :].astype(jnp.float32)
        y = y + pltpu.roll(res, shift=M2 - 1, axis=0)   # shift one column left
    o_ref[...] = y.astype(o_ref.dtype)


# ------------------------------ wrapper -------------------------------------


def fold_bn(conv_b, gamma, beta, run_mean, run_var, eps=1e-5):
    """Fold conv bias + eval-mode BatchNorm into per-channel (scale, bias)."""
    s = gamma / jnp.sqrt(run_var + eps)
    b = (conv_b - run_mean) * s + beta
    return s, b


def _prep_conv(p, cin, cin_p, cout, cout_p):
    """OIHW->HWIO, fold BN, pad channels to lane multiples, cast to bf16."""
    w = jnp.transpose(p["w_oihw"], (2, 3, 1, 0))
    w = jnp.pad(w, ((0, 0), (0, 0), (0, cin_p - cin), (0, cout_p - cout)))
    s, b = fold_bn(p["b"], p["gamma"], p["beta"], p["mean"], p["var"])
    s = jnp.pad(s, (0, cout_p - cout), constant_values=1.0)
    b = jnp.pad(b, (0, cout_p - cout))
    return (w.astype(jnp.bfloat16),
            s.reshape(1, cout_p).astype(jnp.float32),
            b.reshape(1, cout_p).astype(jnp.float32))


@functools.partial(jax.jit, static_argnames=("shortcut", "tile_h"))
def bottleneck_forward(x_nchw, p1, p2, shortcut=True, tile_h=None):
    """Bottleneck.forward: x (N,C,H,W) -> (N,C_out,H,W)."""
    N, Cin, H, W = x_nchw.shape
    Cout = p1["gamma"].shape[0]
    use_shortcut = bool(shortcut) and (Cin == Cout)

    cin_p = _round_up(Cin, LANE)
    cout_p = _round_up(Cout, LANE)
    WP = _round_up(W + 2, ROW_ALIGN)
    # Wrap-around garbage from the pltpu.roll shifts must land only in
    # discarded padding columns; that needs WP >= W + 2.
    assert WP >= W + 2, (WP, W)

    # Generation-aware VMEM budget (v5e/v6e: 128 MiB, v7x: 64 MiB per core).
    weight_bytes = 2 * 9 * (cin_p * cout_p + cout_p * cout_p) * 2  # both, double-buffered
    vmem_limit = min(int(_vmem_capacity_bytes() * 0.70), 96 * 1024 * 1024)
    budget = max(1, int(vmem_limit * 0.60) - weight_bytes)
    TH = tile_h if tile_h is not None else _pick_tile_h(H, N, WP, cin_p, cout_p, budget)
    if H % TH != 0:
        raise ValueError(f"tile_h={TH} must divide H={H}")
    T = H // TH

    w1, s1, b1 = _prep_conv(p1, Cin, cin_p, Cout, cout_p)
    w2, s2, b2 = _prep_conv(p2, Cout, cout_p, Cout, cout_p)

    # Precomputed column keep-mask (kept cols = real image cols 1..W in padded
    # coords); replaces the per-step iota/compare/where in the kernel.
    keep = ((jnp.arange(WP) >= 1) & (jnp.arange(WP) <= W)).astype(jnp.float32)
    keep = jnp.broadcast_to(keep[:, None], (WP, cout_p))

    # NCHW -> NHWC, zero-pad (H: +2/+2 for the fused 5x5 receptive field,
    # W: 1 left / up to aligned WP right, channels to lane multiple), bf16.
    x = jnp.transpose(x_nchw, (0, 2, 3, 1))
    x = jnp.pad(x, ((0, 0), (2, 2), (1, WP - W - 1), (0, cin_p - Cin)))
    x = x.astype(jnp.bfloat16)
    # Overlapping haloed row strips -> plain BlockSpec pipelining (automatic
    # double-buffering, hidden DMA, megacore-safe) replaces the old manual,
    # fully-exposed halo DMA.
    # TODO(synk): this pre-pass still writes one padded/strip-duplicated bf16
    # copy of x to HBM; fully in-kernel padding would remove it.
    strips = jnp.stack([x[:, t * TH:t * TH + TH + 4] for t in range(T)], axis=1)
    strips = strips.reshape(N, T, (TH + 4) * WP, cin_p)

    kernel = functools.partial(_bottleneck_kernel, W=W, WP=WP, TH=TH,
                               shortcut=use_shortcut)
    out = pl.pallas_call(
        kernel,
        out_shape=jax.ShapeDtypeStruct((N, H * WP, cout_p), jnp.bfloat16),
        grid_spec=pltpu.PrefetchScalarGridSpec(
            num_scalar_prefetch=0,
            grid=(N, T),
            in_specs=[
                pl.BlockSpec((None, None, (TH + 4) * WP, cin_p),
                             lambda n, t: (n, t, 0, 0)),                 # x strip
                pl.BlockSpec((3, 3, cin_p, cout_p), lambda n, t: (0, 0, 0, 0)),
                pl.BlockSpec((1, cout_p), lambda n, t: (0, 0)),
                pl.BlockSpec((1, cout_p), lambda n, t: (0, 0)),
                pl.BlockSpec((3, 3, cout_p, cout_p), lambda n, t: (0, 0, 0, 0)),
                pl.BlockSpec((1, cout_p), lambda n, t: (0, 0)),
                pl.BlockSpec((1, cout_p), lambda n, t: (0, 0)),
                pl.BlockSpec((WP, cout_p), lambda n, t: (0, 0)),          # keep mask
            ],
            out_specs=pl.BlockSpec((None, TH * WP, cout_p),
                                   lambda n, t: (n, t, 0)),
            scratch_shapes=[
                pltpu.VMEM(((TH + 2) * WP, cout_p), jnp.bfloat16),        # h1 strip
            ],
        ),
        compiler_params=pltpu.CompilerParams(
            dimension_semantics=("parallel", "parallel"),
            vmem_limit_bytes=vmem_limit),
    )(strips, w1, s1, b1, w2, s2, b2, keep)

    out = out.reshape(N, H, WP, cout_p)[:, :, :W, :Cout]
    return jnp.transpose(out, (0, 3, 1, 2)).astype(jnp.float32)  # NHWC -> NCHW


# -------------------------- params & reference ------------------------------


def init_conv_module_params(key, c1, c2):
    """Deterministic params for ConvModule(c1->c2, k=3, BN, ReLU)."""
    k1, k2, k3, k4, k5, k6 = jax.random.split(key, 6)
    w = jax.random.normal(k1, (c2, c1, 3, 3), jnp.float32) * 0.1  # OIHW
    b = jax.random.normal(k2, (c2,), jnp.float32) * 0.1
    gamma = 1.0 + 0.1 * jax.random.normal(k3, (c2,), jnp.float32)
    beta = 0.1 * jax.random.normal(k4, (c2,), jnp.float32)
    run_mean = 0.1 * jax.random.normal(k5, (c2,), jnp.float32)
    run_var = 0.5 + jnp.abs(jax.random.normal(k6, (c2,), jnp.float32))
    return {"w_oihw": w, "b": b, "gamma": gamma, "beta": beta,
            "mean": run_mean, "var": run_var}


def _ref_conv_module(x_nchw, p):
    y = jax.lax.conv_general_dilated(
        x_nchw, p["w_oihw"], window_strides=(1, 1), padding=((1, 1), (1, 1)),
        dimension_numbers=("NCHW", "OIHW", "NCHW"))
    y = y + p["b"][None, :, None, None]
    s = p["gamma"] / jnp.sqrt(p["var"] + 1e-5)
    y = (y - p["mean"][None, :, None, None]) * s[None, :, None, None] \
        + p["beta"][None, :, None, None]
    return jnp.maximum(y, 0.0)


def _ref_bottleneck(x_nchw, p1, p2, shortcut):
    h = _ref_conv_module(_ref_conv_module(x_nchw, p1), p2)
    return x_nchw + h if shortcut else h


if __name__ == "__main__":
    key = jax.random.PRNGKey(0)
    kx, k1, k2 = jax.random.split(key, 3)

    N, C, H, W = 2, 4, 16, 16          # in_dim == out_dim so shortcut is active
    x = jax.random.normal(kx, (N, C, H, W), jnp.float32)
    p1 = init_conv_module_params(k1, C, C)
    p2 = init_conv_module_params(k2, C, C)

    # Main path: shortcut active, explicit small row-strip (4 strips -> halos,
    # interior strips and boundary masking all exercised).
    out = jax.block_until_ready(
        bottleneck_forward(x, p1, p2, shortcut=True, tile_h=4))
    ref = _ref_bottleneck(x, p1, p2, True)
    assert out.shape == (N, C, H, W)
    err = float(jnp.max(jnp.abs(out - ref)))
    assert jnp.allclose(out, ref, rtol=8e-2, atol=8e-2), f"mismatch: {err}"

    # Second path: no shortcut, auto-selected strip height (single strip per
    # image -> top and bottom boundary handling within one step).
    out2 = jax.block_until_ready(bottleneck_forward(x, p1, p2, shortcut=False))
    ref2 = _ref_bottleneck(x, p1, p2, False)
    err2 = float(jnp.max(jnp.abs(out2 - ref2)))
    assert jnp.allclose(out2, ref2, rtol=8e-2, atol=8e-2), f"mismatch: {err2}"

    print("KERNEL_OK")
</pallas_src>

<mosaic_0001>
module attributes {stable_mosaic.version = 11 : i64} {
  func.func @_bottleneck_kernel(%arg0: i32, %arg1: i32, %arg2: memref<1x1x256x128xbf16, #tpu.memory_space<vmem>>, %arg3: memref<3x3x128x128xbf16, #tpu.memory_space<vmem>>, %arg4: memref<1x128xf32, #tpu.memory_space<vmem>>, %arg5: memref<1x128xf32, #tpu.memory_space<vmem>>, %arg6: memref<3x3x128x128xbf16, #tpu.memory_space<vmem>>, %arg7: memref<1x128xf32, #tpu.memory_space<vmem>>, %arg8: memref<1x128xf32, #tpu.memory_space<vmem>>, %arg9: memref<32x128xf32, #tpu.memory_space<vmem>>, %arg10: memref<1x128x128xbf16, #tpu.memory_space<vmem>>, %arg11: memref<192x128xbf16, #tpu.memory_space<vmem>>) attributes {dimension_semantics = [#tpu.dimension_semantics<parallel>, #tpu.dimension_semantics<parallel>], iteration_bounds = array<i64: 2, 4>, scalar_prefetch = 0 : i64, scratch_operands = 1 : i64, tpu.core_type = #tpu.core_type<tc>, window_params = [{transform_indices = @transform_0, window_bounds = array<i64: 1, 1, 256, 128>}, {pipeline_mode = #tpu.pipeline_mode<synchronous>, transform_indices = @transform_1, window_bounds = array<i64: 3, 3, 128, 128>}, {pipeline_mode = #tpu.pipeline_mode<synchronous>, transform_indices = @transform_2, window_bounds = array<i64: 1, 128>}, {pipeline_mode = #tpu.pipeline_mode<synchronous>, transform_indices = @transform_3, window_bounds = array<i64: 1, 128>}, {pipeline_mode = #tpu.pipeline_mode<synchronous>, transform_indices = @transform_4, window_bounds = array<i64: 3, 3, 128, 128>}, {pipeline_mode = #tpu.pipeline_mode<synchronous>, transform_indices = @transform_5, window_bounds = array<i64: 1, 128>}, {pipeline_mode = #tpu.pipeline_mode<synchronous>, transform_indices = @transform_6, window_bounds = array<i64: 1, 128>}, {pipeline_mode = #tpu.pipeline_mode<synchronous>, transform_indices = @transform_7, window_bounds = array<i64: 32, 128>}, {transform_indices = @transform_8, window_bounds = array<i64: 1, 128, 128>}]} {
    %cst = arith.constant 0.000000e+00 : f32
    %0 = vector.broadcast %cst : f32 to vector<192x128xf32>
    %cst_0 = arith.constant 0.000000e+00 : f32
    %1 = vector.broadcast %cst_0 : f32 to vector<192x128xf32>
    %c0 = arith.constant 0 : index
    %c0_1 = arith.constant 0 : index
    %c0_2 = arith.constant 0 : index
    %c0_3 = arith.constant 0 : index
    %2 = vector.load %arg2[%c0, %c0_1, %c0_2, %c0_3] : memref<1x1x256x128xbf16, #tpu.memory_space<vmem>>, vector<1x1x192x128xbf16>
    %3 = vector.shape_cast %2 : vector<1x1x192x128xbf16> to vector<192x128xbf16>
    %c0_4 = arith.constant 0 : index
    %c0_5 = arith.constant 0 : index
    %c0_6 = arith.constant 0 : index
    %c0_7 = arith.constant 0 : index
    %4 = vector.load %arg3[%c0_4, %c0_5, %c0_6, %c0_7] : memref<3x3x128x128xbf16, #tpu.memory_space<vmem>>, vector<1x1x128x128xbf16>
    %5 = vector.shape_cast %4 : vector<1x1x128x128xbf16> to vector<128x128xbf16>
    %cst_8 = arith.constant dense<0.000000e+00> : vector<192x128xf32>
    %6 = tpu.matmul %3, %5, %cst_8 {dimension_numbers = #tpu.dot_dimension_numbers<[1], [0], [0], [1], [0, 0, 1, 1], [], []>} : vector<192x128xbf16>, vector<128x128xbf16>, vector<192x128xf32> -> vector<192x128xf32>
    %7 = arith.addf %1, %6 : vector<192x128xf32>
    %c0_9 = arith.constant 0 : index
    %c0_10 = arith.constant 0 : index
    %c32 = arith.constant 32 : index
    %c0_11 = arith.constant 0 : index
    %8 = vector.load %arg2[%c0_9, %c0_10, %c32, %c0_11] : memref<1x1x256x128xbf16, #tpu.memory_space<vmem>>, vector<1x1x192x128xbf16>
    %9 = vector.shape_cast %8 : vector<1x1x192x128xbf16> to vector<192x128xbf16>
    %c1 = arith.constant 1 : index
    %c0_12 = arith.constant 0 : index
    %c0_13 = arith.constant 0 : index
    %c0_14 = arith.constant 0 : index
    %10 = vector.load %arg3[%c1, %c0_12, %c0_13, %c0_14] : memref<3x3x128x128xbf16, #tpu.memory_space<vmem>>, vector<1x1x128x128xbf16>
    %11 = vector.shape_cast %10 : vector<1x1x128x128xbf16> to vector<128x128xbf16>
    %cst_15 = arith.constant dense<0.000000e+00> : vector<192x128xf32>
    %12 = tpu.matmul %9, %11, %cst_15 {dimension_numbers = #tpu.dot_dimension_numbers<[1], [0], [0], [1], [0, 0, 1, 1], [], []>} : vector<192x128xbf16>, vector<128x128xbf16>, vector<192x128xf32> -> vector<192x128xf32>
    %13 = arith.addf %7, %12 : vector<192x128xf32>
    %c0_16 = arith.constant 0 : index
    %c0_17 = arith.constant 0 : index
    %c64 = arith.constant 64 : index
    %c0_18 = arith.constant 0 : index
    %14 = vector.load %arg2[%c0_16, %c0_17, %c64, %c0_18] : memref<1x1x256x128xbf16, #tpu.memory_space<vmem>>, vector<1x1x192x128xbf16>
    %15 = vector.shape_cast %14 : vector<1x1x192x128xbf16> to vector<192x128xbf16>
    %c2 = arith.constant 2 : index
    %c0_19 = arith.constant 0 : index
    %c0_20 = arith.constant 0 : index
    %c0_21 = arith.constant 0 : index
    %16 = vector.load %arg3[%c2, %c0_19, %c0_20, %c0_21] : memref<3x3x128x128xbf16, #tpu.memory_space<vmem>>, vector<1x1x128x128xbf16>
    %17 = vector.shape_cast %16 : vector<1x1x128x128xbf16> to vector<128x128xbf16>
    %cst_22 = arith.constant dense<0.000000e+00> : vector<192x128xf32>
    %18 = tpu.matmul %15, %17, %cst_22 {dimension_numbers = #tpu.dot_dimension_numbers<[1], [0], [0], [1], [0, 0, 1, 1], [], []>} : vector<192x128xbf16>, vector<128x128xbf16>, vector<192x128xf32> -> vector<192x128xf32>
    %19 = arith.addf %13, %18 : vector<192x128xf32>
    %c1_i32 = arith.constant 1 : i32
    %20 = tpu.dynamic_rotate %19 by %c1_i32 dim 0 : vector<192x128xf32>, i32 -> vector<192x128xf32>
    %21 = arith.addf %0, %20 : vector<192x128xf32>
    %cst_23 = arith.constant 0.000000e+00 : f32
    %22 = vector.broadcast %cst_23 : f32 to vector<192x128xf32>
    %c0_24 = arith.constant 0 : index
    %c0_25 = arith.constant 0 : index
    %c0_26 = arith.constant 0 : index
    %c0_27 = arith.constant 0 : index
    %23 = vector.load %arg2[%c0_24, %c0_25, %c0_26, %c0_27] : memref<1x1x256x128xbf16, #tpu.memory_space<vmem>>, vector<1x1x192x128xbf16>
    %24 = vector.shape_cast %23 : vector<1x1x192x128xbf16> to vector<192x128xbf16>
    %c0_28 = arith.constant 0 : index
    %c1_29 = arith.constant 1 : index
    %c0_30 = arith.constant 0 : index
    %c0_31 = arith.constant 0 : index
    %25 = vector.load %arg3[%c0_28, %c1_29, %c0_30, %c0_31] : memref<3x3x128x128xbf16, #tpu.memory_space<vmem>>, vector<1x1x128x128xbf16>
    %26 = vector.shape_cast %25 : vector<1x1x128x128xbf16> to vector<128x128xbf16>
    %cst_32 = arith.constant dense<0.000000e+00> : vector<192x128xf32>
    %27 = tpu.matmul %24, %26, %cst_32 {dimension_numbers = #tpu.dot_dimension_numbers<[1], [0], [0], [1], [0, 0, 1, 1], [], []>} : vector<192x128xbf16>, vector<128x128xbf16>, vector<192x128xf32> -> vector<192x128xf32>
    %28 = arith.addf %22, %27 : vector<192x128xf32>
    %c0_33 = arith.constant 0 : index
    %c0_34 = arith.constant 0 : index
    %c32_35 = arith.constant 32 : index
    %c0_36 = arith.constant 0 : index
    %29 = vector.load %arg2[%c0_33, %c0_34, %c32_35, %c0_36] : memref<1x1x256x128xbf16, #tpu.memory_space<vmem>>, vector<1x1x192x128xbf16>
    %30 = vector.shape_cast %29 : vector<1x1x192x128xbf16> to vector<192x128xbf16>
    %c1_37 = arith.constant 1 : index
    %c1_38 = arith.constant 1 : index
    %c0_39 = arith.constant 0 : index
    %c0_40 = arith.constant 0 : index
    %31 = vector.load %arg3[%c1_37, %c1_38, %c0_39, %c0_40] : memref<3x3x128x128xbf16, #tpu.memory_space<vmem>>, vector<1x1x128x128xbf16>
    %32 = vector.shape_cast %31 : vector<1x1x128x128xbf16> to vector<128x128xbf16>
    %cst_41 = arith.constant dense<0.000000e+00> : vector<192x128xf32>
    %33 = tpu.matmul %30, %32, %cst_41 {dimension_numbers = #tpu.dot_dimension_numbers<[1], [0], [0], [1], [0, 0, 1, 1], [], []>} : vector<192x128xbf16>, vector<128x128xbf16>, vector<192x128xf32> -> vector<192x128xf32>
    %34 = arith.addf %28, %33 : vector<192x128xf32>
    %c0_42 = arith.constant 0 : index
    %c0_43 = arith.constant 0 : index
    %c64_44 = arith.constant 64 : index
    %c0_45 = arith.constant 0 : index
    %35 = vector.load %arg2[%c0_42, %c0_43, %c64_44, %c0_45] : memref<1x1x256x128xbf16, #tpu.memory_space<vmem>>, vector<1x1x192x128xbf16>
    %36 = vector.shape_cast %35 : vector<1x1x192x128xbf16> to vector<192x128xbf16>
    %c2_46 = arith.constant 2 : index
    %c1_47 = arith.constant 1 : index
    %c0_48 = arith.constant 0 : index
    %c0_49 = arith.constant 0 : index
    %37 = vector.load %arg3[%c2_46, %c1_47, %c0_48, %c0_49] : memref<3x3x128x128xbf16, #tpu.memory_space<vmem>>, vector<1x1x128x128xbf16>
    %38 = vector.shape_cast %37 : vector<1x1x128x128xbf16> to vector<128x128xbf16>
    %cst_50 = arith.constant dense<0.000000e+00> : vector<192x128xf32>
    %39 = tpu.matmul %36, %38, %cst_50 {dimension_numbers = #tpu.dot_dimension_numbers<[1], [0], [0], [1], [0, 0, 1, 1], [], []>} : vector<192x128xbf16>, vector<128x128xbf16>, vector<192x128xf32> -> vector<192x128xf32>
    %40 = arith.addf %34, %39 : vector<192x128xf32>
    %41 = arith.addf %21, %40 : vector<192x128xf32>
    %cst_51 = arith.constant 0.000000e+00 : f32
    %42 = vector.broadcast %cst_51 : f32 to vector<192x128xf32>
    %c0_52 = arith.constant 0 : index
    %c0_53 = arith.constant 0 : index
    %c0_54 = arith.constant 0 : index
    %c0_55 = arith.constant 0 : index
    %43 = vector.load %arg2[%c0_52, %c0_53, %c0_54, %c0_55] : memref<1x1x256x128xbf16, #tpu.memory_space<vmem>>, vector<1x1x192x128xbf16>
    %44 = vector.shape_cast %43 : vector<1x1x192x128xbf16> to vector<192x128xbf16>
    %c0_56 = arith.constant 0 : index
    %c2_57 = arith.constant 2 : index
    %c0_58 = arith.constant 0 : index
    %c0_59 = arith.constant 0 : index
    %45 = vector.load %arg3[%c0_56, %c2_57, %c0_58, %c0_59] : memref<3x3x128x128xbf16, #tpu.memory_space<vmem>>, vector<1x1x128x128xbf16>
    %46 = vector.shape_cast %45 : vector<1x1x128x128xbf16> to vector<128x128xbf16>
    %cst_60 = arith.constant dense<0.000000e+00> : vector<192x128xf32>
    %47 = tpu.matmul %44, %46, %cst_60 {dimension_numbers = #tpu.dot_dimension_numbers<[1], [0], [0], [1], [0, 0, 1, 1], [], []>} : vector<192x128xbf16>, vector<128x128xbf16>, vector<192x128xf32> -> vector<192x128xf32>
    %48 = arith.addf %42, %47 : vector<192x128xf32>
    %c0_61 = arith.constant 0 : index
    %c0_62 = arith.constant 0 : index
    %c32_63 = arith.constant 32 : index
    %c0_64 = arith.constant 0 : index
    %49 = vector.load %arg2[%c0_61, %c0_62, %c32_63, %c0_64] : memref<1x1x256x128xbf16, #tpu.memory_space<vmem>>, vector<1x1x192x128xbf16>
    %50 = vector.shape_cast %49 : vector<1x1x192x128xbf16> to vector<192x128xbf16>
    %c1_65 = arith.constant 1 : index
    %c2_66 = arith.constant 2 : index
    %c0_67 = arith.constant 0 : index
    %c0_68 = arith.constant 0 : index
    %51 = vector.load %arg3[%c1_65, %c2_66, %c0_67, %c0_68] : memref<3x3x128x128xbf16, #tpu.memory_space<vmem>>, vector<1x1x128x128xbf16>
    %52 = vector.shape_cast %51 : vector<1x1x128x128xbf16> to vector<128x128xbf16>
    %cst_69 = arith.constant dense<0.000000e+00> : vector<192x128xf32>
    %53 = tpu.matmul %50, %52, %cst_69 {dimension_numbers = #tpu.dot_dimension_numbers<[1], [0], [0], [1], [0, 0, 1, 1], [], []>} : vector<192x128xbf16>, vector<128x128xbf16>, vector<192x128xf32> -> vector<192x128xf32>
    %54 = arith.addf %48, %53 : vector<192x128xf32>
    %c0_70 = arith.constant 0 : index
    %c0_71 = arith.constant 0 : index
    %c64_72 = arith.constant 64 : index
    %c0_73 = arith.constant 0 : index
    %55 = vector.load %arg2[%c0_70, %c0_71, %c64_72, %c0_73] : memref<1x1x256x128xbf16, #tpu.memory_space<vmem>>, vector<1x1x192x128xbf16>
    %56 = vector.shape_cast %55 : vector<1x1x192x128xbf16> to vector<192x128xbf16>
    %c2_74 = arith.constant 2 : index
    %c2_75 = arith.constant 2 : index
    %c0_76 = arith.constant 0 : index
    %c0_77 = arith.constant 0 : index
    %57 = vector.load %arg3[%c2_74, %c2_75, %c0_76, %c0_77] : memref<3x3x128x128xbf16, #tpu.memory_space<vmem>>, vector<1x1x128x128xbf16>
    %58 = vector.shape_cast %57 : vector<1x1x128x128xbf16> to vector<128x128xbf16>
    %cst_78 = arith.constant dense<0.000000e+00> : vector<192x128xf32>
    %59 = tpu.matmul %56, %58, %cst_78 {dimension_numbers = #tpu.dot_dimension_numbers<[1], [0], [0], [1], [0, 0, 1, 1], [], []>} : vector<192x128xbf16>, vector<128x128xbf16>, vector<192x128xf32> -> vector<192x128xf32>
    %60 = arith.addf %54, %59 : vector<192x128xf32>
    %c191_i32 = arith.constant 191 : i32
    %61 = tpu.dynamic_rotate %60 by %c191_i32 dim 0 : vector<192x128xf32>, i32 -> vector<192x128xf32>
    %62 = arith.addf %41, %61 : vector<192x128xf32>
    %c0_79 = arith.constant 0 : index
    %c0_80 = arith.constant 0 : index
    %63 = vector.load %arg4[%c0_79, %c0_80] : memref<1x128xf32, #tpu.memory_space<vmem>>, vector<1x128xf32>
    %64 = vector.broadcast %63 : vector<1x128xf32> to vector<192x128xf32>
    %65 = arith.mulf %62, %64 : vector<192x128xf32>
    %c0_81 = arith.constant 0 : index
    %c0_82 = arith.constant 0 : index
    %66 = vector.load %arg5[%c0_81, %c0_82] : memref<1x128xf32, #tpu.memory_space<vmem>>, vector<1x128xf32>
    %67 = vector.broadcast %66 : vector<1x128xf32> to vector<192x128xf32>
    %68 = arith.addf %65, %67 : vector<192x128xf32>
    %cst_83 = arith.constant 0.000000e+00 : f32
    %69 = vector.broadcast %cst_83 : f32 to vector<192x128xf32>
    %70 = arith.maximumf %68, %69 : vector<192x128xf32>
    %71 = vector.shape_cast %70 : vector<192x128xf32> to vector<6x32x128xf32>
    %c0_84 = arith.constant 0 : index
    %c0_85 = arith.constant 0 : index
    %72 = vector.load %arg9[%c0_84, %c0_85] : memref<32x128xf32, #tpu.memory_space<vmem>>, vector<32x128xf32>
    %73 = vector.shape_cast %72 : vector<32x128xf32> to vector<1x32x128xf32>
    %74 = vector.broadcast %73 : vector<1x32x128xf32> to vector<6x32x128xf32>
    %75 = arith.mulf %71, %74 : vector<6x32x128xf32>
    %76 = vector.shape_cast %75 : vector<6x32x128xf32> to vector<192x128xf32>
    %77 = arith.truncf %76 : vector<192x128xf32> to vector<192x128xbf16>
    %c0_86 = arith.constant 0 : index
    %c0_87 = arith.constant 0 : index
    %78 = vector.load %arg11[%c0_86, %c0_87] : memref<192x128xbf16, #tpu.memory_space<vmem>>, vector<192x128xbf16>
    tpu.vector_store %arg11[%c0_86, %c0_87], %77 {strides = array<i32>} : memref<192x128xbf16, #tpu.memory_space<vmem>>, vector<192x128xbf16>,
    %c0_i32 = arith.constant 0 : i32
    %79 = arith.cmpi eq, %arg1, %c0_i32 : i32
    %80 = arith.extui %79 : i1 to i32
    %c0_i32_88 = arith.constant 0 : i32
    %81 = arith.cmpi ne, %80, %c0_i32_88 : i32
    scf.if %81 {
      %cst_170 = arith.constant 0.000000e+00 : bf16
      %156 = vector.broadcast %cst_170 : bf16 to vector<32x128xbf16>
      %c0_171 = arith.constant 0 : index
      %c0_172 = arith.constant 0 : index
      %157 = vector.load %arg11[%c0_171, %c0_172] : memref<192x128xbf16, #tpu.memory_space<vmem>>, vector<32x128xbf16>
      tpu.vector_store %arg11[%c0_171, %c0_172], %156 {strides = array<i32>} : memref<192x128xbf16, #tpu.memory_space<vmem>>, vector<32x128xbf16>,
    } else {
    }
    %c3_i32 = arith.constant 3 : i32
    %82 = arith.cmpi eq, %arg1, %c3_i32 : i32
    %83 = arith.extui %82 : i1 to i32
    %c0_i32_89 = arith.constant 0 : i32
    %84 = arith.cmpi ne, %83, %c0_i32_89 : i32
    scf.if %84 {
      %cst_170 = arith.constant 0.000000e+00 : bf16
      %156 = vector.broadcast %cst_170 : bf16 to vector<32x128xbf16>
      %c160 = arith.constant 160 : index
      %c0_171 = arith.constant 0 : index
      %157 = vector.load %arg11[%c160, %c0_171] : memref<192x128xbf16, #tpu.memory_space<vmem>>, vector<32x128xbf16>
      tpu.vector_store %arg11[%c160, %c0_171], %156 {strides = array<i32>} : memref<192x128xbf16, #tpu.memory_space<vmem>>, vector<32x128xbf16>,
    } else {
    }
    %cst_90 = arith.constant 0.000000e+00 : f32
    %85 = vector.broadcast %cst_90 : f32 to vector<128x128xf32>
    %cst_91 = arith.constant 0.000000e+00 : f32
    %86 = vector.broadcast %cst_91 : f32 to vector<128x128xf32>
    %c0_92 = arith.constant 0 : index
    %c0_93 = arith.constant 0 : index
    %87 = vector.load %arg11[%c0_92, %c0_93] : memref<192x128xbf16, #tpu.memory_space<vmem>>, vector<128x128xbf16>
    %c0_94 = arith.constant 0 : index
    %c0_95 = arith.constant 0 : index
    %c0_96 = arith.constant 0 : index
    %c0_97 = arith.constant 0 : index
    %88 = vector.load %arg6[%c0_94, %c0_95, %c0_96, %c0_97] : memref<3x3x128x128xbf16, #tpu.memory_space<vmem>>, vector<1x1x128x128xbf16>
    %89 = vector.shape_cast %88 : vector<1x1x128x128xbf16> to vector<128x128xbf16>
    %cst_98 = arith.constant dense<0.000000e+00> : vector<128x128xf32>
    %90 = tpu.matmul %87, %89, %cst_98 {dimension_numbers = #tpu.dot_dimension_numbers<[1], [0], [0], [1], [0, 0, 1, 1], [], []>} : vector<128x128xbf16>, vector<128x128xbf16>, vector<128x128xf32> -> vector<128x128xf32>
    %91 = arith.addf %86, %90 : vector<128x128xf32>
    %c32_99 = arith.constant 32 : index
    %c0_100 = arith.constant 0 : index
    %92 = vector.load %arg11[%c32_99, %c0_100] : memref<192x128xbf16, #tpu.memory_space<vmem>>, vector<128x128xbf16>
    %c1_101 = arith.constant 1 : index
    %c0_102 = arith.constant 0 : index
    %c0_103 = arith.constant 0 : index
    %c0_104 = arith.constant 0 : index
    %93 = vector.load %arg6[%c1_101, %c0_102, %c0_103, %c0_104] : memref<3x3x128x128xbf16, #tpu.memory_space<vmem>>, vector<1x1x128x128xbf16>
    %94 = vector.shape_cast %93 : vector<1x1x128x128xbf16> to vector<128x128xbf16>
    %cst_105 = arith.constant dense<0.000000e+00> : vector<128x128xf32>
    %95 = tpu.matmul %92, %94, %cst_105 {dimension_numbers = #tpu.dot_dimension_numbers<[1], [0], [0], [1], [0, 0, 1, 1], [], []>} : vector<128x128xbf16>, vector<128x128xbf16>, vector<128x128xf32> -> vector<128x128xf32>
    %96 = arith.addf %91, %95 : vector<128x128xf32>
    %c64_106 = arith.constant 64 : index
    %c0_107 = arith.constant 0 : index
    %97 = vector.load %arg11[%c64_106, %c0_107] : memref<192x128xbf16, #tpu.memory_space<vmem>>, vector<128x128xbf16>
    %c2_108 = arith.constant 2 : index
    %c0_109 = arith.constant 0 : index
    %c0_110 = arith.constant 0 : index
    %c0_111 = arith.constant 0 : index
    %98 = vector.load %arg6[%c2_108, %c0_109, %c0_110, %c0_111] : memref<3x3x128x128xbf16, #tpu.memory_space<vmem>>, vector<1x1x128x128xbf16>
    %99 = vector.shape_cast %98 : vector<1x1x128x128xbf16> to vector<128x128xbf16>
    %cst_112 = arith.constant dense<0.000000e+00> : vector<128x128xf32>
    %100 = tpu.matmul %97, %99, %cst_112 {dimension_numbers = #tpu.dot_dimension_numbers<[1], [0], [0], [1], [0, 0, 1, 1], [], []>} : vector<128x128xbf16>, vector<128x128xbf16>, vector<128x128xf32> -> vector<128x128xf32>
    %101 = arith.addf %96, %100 : vector<128x128xf32>
    %102 = arith.addf %85, %101 : vector<128x128xf32>
    %cst_113 = arith.constant 0.000000e+00 : f32
    %103 = vector.broadcast %cst_113 : f32 to vector<128x128xf32>
    %c0_114 = arith.constant 0 : index
    %c0_115 = arith.constant 0 : index
    %104 = vector.load %arg11[%c0_114, %c0_115] : memref<192x128xbf16, #tpu.memory_space<vmem>>, vector<128x128xbf16>
    %c0_116 = arith.constant 0 : index
    %c1_117 = arith.constant 1 : index
    %c0_118 = arith.constant 0 : index
    %c0_119 = arith.constant 0 : index
    %105 = vector.load %arg6[%c0_116, %c1_117, %c0_118, %c0_119] : memref<3x3x128x128xbf16, #tpu.memory_space<vmem>>, vector<1x1x128x128xbf16>
    %106 = vector.shape_cast %105 : vector<1x1x128x128xbf16> to vector<128x128xbf16>
    %cst_120 = arith.constant dense<0.000000e+00> : vector<128x128xf32>
    %107 = tpu.matmul %104, %106, %cst_120 {dimension_numbers = #tpu.dot_dimension_numbers<[1], [0], [0], [1], [0, 0, 1, 1], [], []>} : vector<128x128xbf16>, vector<128x128xbf16>, vector<128x128xf32> -> vector<128x128xf32>
    %108 = arith.addf %103, %107 : vector<128x128xf32>
    %c32_121 = arith.constant 32 : index
    %c0_122 = arith.constant 0 : index
    %109 = vector.load %arg11[%c32_121, %c0_122] : memref<192x128xbf16, #tpu.memory_space<vmem>>, vector<128x128xbf16>
    %c1_123 = arith.constant 1 : index
    %c1_124 = arith.constant 1 : index
    %c0_125 = arith.constant 0 : index
    %c0_126 = arith.constant 0 : index
    %110 = vector.load %arg6[%c1_123, %c1_124, %c0_125, %c0_126] : memref<3x3x128x128xbf16, #tpu.memory_space<vmem>>, vector<1x1x128x128xbf16>
    %111 = vector.shape_cast %110 : vector<1x1x128x128xbf16> to vector<128x128xbf16>
    %cst_127 = arith.constant dense<0.000000e+00> : vector<128x128xf32>
    %112 = tpu.matmul %109, %111, %cst_127 {dimension_numbers = #tpu.dot_dimension_numbers<[1], [0], [0], [1], [0, 0, 1, 1], [], []>} : vector<128x128xbf16>, vector<128x128xbf16>, vector<128x128xf32> -> vector<128x128xf32>
    %113 = arith.addf %108, %112 : vector<128x128xf32>
    %c64_128 = arith.constant 64 : index
    %c0_129 = arith.constant 0 : index
    %114 = vector.load %arg11[%c64_128, %c0_129] : memref<192x128xbf16, #tpu.memory_space<vmem>>, vector<128x128xbf16>
    %c2_130 = arith.constant 2 : index
    %c1_131 = arith.constant 1 : index
    %c0_132 = arith.constant 0 : index
    %c0_133 = arith.constant 0 : index
    %115 = vector.load %arg6[%c2_130, %c1_131, %c0_132, %c0_133] : memref<3x3x128x128xbf16, #tpu.memory_space<vmem>>, vector<1x1x128x128xbf16>
    %116 = vector.shape_cast %115 : vector<1x1x128x128xbf16> to vector<128x128xbf16>
    %cst_134 = arith.constant dense<0.000000e+00> : vector<128x128xf32>
    %117 = tpu.matmul %114, %116, %cst_134 {dimension_numbers = #tpu.dot_dimension_numbers<[1], [0], [0], [1], [0, 0, 1, 1], [], []>} : vector<128x128xbf16>, vector<128x128xbf16>, vector<128x128xf32> -> vector<128x128xf32>
    %118 = arith.addf %113, %117 : vector<128x128xf32>
    %c127_i32 = arith.constant 127 : i32
    %119 = tpu.dynamic_rotate %118 by %c127_i32 dim 0 : vector<128x128xf32>, i32 -> vector<128x128xf32>
    %120 = arith.addf %102, %119 : vector<128x128xf32>
    %cst_135 = arith.constant 0.000000e+00 : f32
    %121 = vector.broadcast %cst_135 : f32 to vector<128x128xf32>
    %c0_136 = arith.constant 0 : index
    %c0_137 = arith.constant 0 : index
    %122 = vector.load %arg11[%c0_136, %c0_137] : memref<192x128xbf16, #tpu.memory_space<vmem>>, vector<128x128xbf16>
    %c0_138 = arith.constant 0 : index
    %c2_139 = arith.constant 2 : index
    %c0_140 = arith.constant 0 : index
    %c0_141 = arith.constant 0 : index
    %123 = vector.load %arg6[%c0_138, %c2_139, %c0_140, %c0_141] : memref<3x3x128x128xbf16, #tpu.memory_space<vmem>>, vector<1x1x128x128xbf16>
    %124 = vector.shape_cast %123 : vector<1x1x128x128xbf16> to vector<128x128xbf16>
    %cst_142 = arith.constant dense<0.000000e+00> : vector<128x128xf32>
    %125 = tpu.matmul %122, %124, %cst_142 {dimension_numbers = #tpu.dot_dimension_numbers<[1], [0], [0], [1], [0, 0, 1, 1], [], []>} : vector<128x128xbf16>, vector<128x128xbf16>, vector<128x128xf32> -> vector<128x128xf32>
    %126 = arith.addf %121, %125 : vector<128x128xf32>
    %c32_143 = arith.constant 32 : index
    %c0_144 = arith.constant 0 : index
    %127 = vector.load %arg11[%c32_143, %c0_144] : memref<192x128xbf16, #tpu.memory_space<vmem>>, vector<128x128xbf16>
    %c1_145 = arith.constant 1 : index
    %c2_146 = arith.constant 2 : index
    %c0_147 = arith.constant 0 : index
    %c0_148 = arith.constant 0 : index
    %128 = vector.load %arg6[%c1_145, %c2_146, %c0_147, %c0_148] : memref<3x3x128x128xbf16, #tpu.memory_space<vmem>>, vector<1x1x128x128xbf16>
    %129 = vector.shape_cast %128 : vector<1x1x128x128xbf16> to vector<128x128xbf16>
    %cst_149 = arith.constant dense<0.000000e+00> : vector<128x128xf32>
    %130 = tpu.matmul %127, %129, %cst_149 {dimension_numbers = #tpu.dot_dimension_numbers<[1], [0], [0], [1], [0, 0, 1, 1], [], []>} : vector<128x128xbf16>, vector<128x128xbf16>, vector<128x128xf32> -> vector<128x128xf32>
    %131 = arith.addf %126, %130 : vector<128x128xf32>
    %c64_150 = arith.constant 64 : index
    %c0_151 = arith.constant 0 : index
    %132 = vector.load %arg11[%c64_150, %c0_151] : memref<192x128xbf16, #tpu.memory_space<vmem>>, vector<128x128xbf16>
    %c2_152 = arith.constant 2 : index
    %c2_153 = arith.constant 2 : index
    %c0_154 = arith.constant 0 : index
    %c0_155 = arith.constant 0 : index
    %133 = vector.load %arg6[%c2_152, %c2_153, %c0_154, %c0_155] : memref<3x3x128x128xbf16, #tpu.memory_space<vmem>>, vector<1x1x128x128xbf16>
    %134 = vector.shape_cast %133 : vector<1x1x128x128xbf16> to vector<128x128xbf16>
    %cst_156 = arith.constant dense<0.000000e+00> : vector<128x128xf32>
    %135 = tpu.matmul %132, %134, %cst_156 {dimension_numbers = #tpu.dot_dimension_numbers<[1], [0], [0], [1], [0, 0, 1, 1], [], []>} : vector<128x128xbf16>, vector<128x128xbf16>, vector<128x128xf32> -> vector<128x128xf32>
    %136 = arith.addf %131, %135 : vector<128x128xf32>
    %c126_i32 = arith.constant 126 : i32
    %137 = tpu.dynamic_rotate %136 by %c126_i32 dim 0 : vector<128x128xf32>, i32 -> vector<128x128xf32>
    %138 = arith.addf %120, %137 : vector<128x128xf32>
    %c0_157 = arith.constant 0 : index
    %c0_158 = arith.constant 0 : index
    %139 = vector.load %arg7[%c0_157, %c0_158] : memref<1x128xf32, #tpu.memory_space<vmem>>, vector<1x128xf32>
    %140 = vector.broadcast %139 : vector<1x128xf32> to vector<128x128xf32>
    %141 = arith.mulf %138, %140 : vector<128x128xf32>
    %c0_159 = arith.constant 0 : index
    %c0_160 = arith.constant 0 : index
    %142 = vector.load %arg8[%c0_159, %c0_160] : memref<1x128xf32, #tpu.memory_space<vmem>>, vector<1x128xf32>
    %143 = vector.broadcast %142 : vector<1x128xf32> to vector<128x128xf32>
    %144 = arith.addf %141, %143 : vector<128x128xf32>
    %cst_161 = arith.constant 0.000000e+00 : f32
    %145 = vector.broadcast %cst_161 : f32 to vector<128x128xf32>
    %146 = arith.maximumf %144, %145 : vector<128x128xf32>
    %c0_162 = arith.constant 0 : index
    %c0_163 = arith.constant 0 : index
    %c64_164 = arith.constant 64 : index
    %c0_165 = arith.constant 0 : index
    %147 = vector.load %arg2[%c0_162, %c0_163, %c64_164, %c0_165] : memref<1x1x256x128xbf16, #tpu.memory_space<vmem>>, vector<1x1x128x128xbf16>
    %148 = vector.shape_cast %147 : vector<1x1x128x128xbf16> to vector<128x128xbf16>
    %149 = arith.extf %148 : vector<128x128xbf16> to vector<128x128xf32>
    %c127_i32_166 = arith.constant 127 : i32
    %150 = tpu.dynamic_rotate %149 by %c127_i32_166 dim 0 : vector<128x128xf32>, i32 -> vector<128x128xf32>
    %151 = arith.addf %146, %150 : vector<128x128xf32>
    %152 = arith.truncf %151 : vector<128x128xf32> to vector<128x128xbf16>
    %c0_167 = arith.constant 0 : index
    %c0_168 = arith.constant 0 : index
    %c0_169 = arith.constant 0 : index
    %153 = vector.load %arg10[%c0_167, %c0_168, %c0_169] : memref<1x128x128xbf16, #tpu.memory_space<vmem>>, vector<1x128x128xbf16>
    %154 = vector.shape_cast %153 : vector<1x128x128xbf16> to vector<128x128xbf16>
    %155 = vector.shape_cast %152 : vector<128x128xbf16> to vector<1x128x128xbf16>
    tpu.vector_store %arg10[%c0_167, %c0_168, %c0_169], %155 {strides = array<i32>} : memref<1x128x128xbf16, #tpu.memory_space<vmem>>, vector<1x128x128xbf16>,
    return
  }
  func.func @transform_0(%arg0: i32, %arg1: i32) -> (i32, i32, i32, i32) {
    %c0_i32 = arith.constant 0 : i32
    %c0_i32_0 = arith.constant 0 : i32
    %c0_i32_1 = arith.constant 0 : i32
    return %arg0, %arg1, %c0_i32, %c0_i32_0 : i32, i32, i32, i32
  }
  func.func @transform_1(%arg0: i32, %arg1: i32) -> (i32, i32, i32, i32) {
    %c0_i32 = arith.constant 0 : i32
    %c0_i32_0 = arith.constant 0 : i32
    %c0_i32_1 = arith.constant 0 : i32
    %c0_i32_2 = arith.constant 0 : i32
    %c0_i32_3 = arith.constant 0 : i32
    return %c0_i32, %c0_i32_0, %c0_i32_1, %c0_i32_2 : i32, i32, i32, i32
  }
  func.func @transform_2(%arg0: i32, %arg1: i32) -> (i32, i32) {
    %c0_i32 = arith.constant 0 : i32
    %c0_i32_0 = arith.constant 0 : i32
    %c0_i32_1 = arith.constant 0 : i32
    return %c0_i32, %c0_i32_0 : i32, i32
  }
  func.func @transform_3(%arg0: i32, %arg1: i32) -> (i32, i32) {
    %c0_i32 = arith.constant 0 : i32
    %c0_i32_0 = arith.constant 0 : i32
    %c0_i32_1 = arith.constant 0 : i32
    return %c0_i32, %c0_i32_0 : i32, i32
  }
  func.func @transform_4(%arg0: i32, %arg1: i32) -> (i32, i32, i32, i32) {
    %c0_i32 = arith.constant 0 : i32
    %c0_i32_0 = arith.constant 0 : i32
    %c0_i32_1 = arith.constant 0 : i32
    %c0_i32_2 = arith.constant 0 : i32
    %c0_i32_3 = arith.constant 0 : i32
    return %c0_i32, %c0_i32_0, %c0_i32_1, %c0_i32_2 : i32, i32, i32, i32
  }
  func.func @transform_5(%arg0: i32, %arg1: i32) -> (i32, i32) {
    %c0_i32 = arith.constant 0 : i32
    %c0_i32_0 = arith.constant 0 : i32
    %c0_i32_1 = arith.constant 0 : i32
    return %c0_i32, %c0_i32_0 : i32, i32
  }
  func.func @transform_6(%arg0: i32, %arg1: i32) -> (i32, i32) {
    %c0_i32 = arith.constant 0 : i32
    %c0_i32_0 = arith.constant 0 : i32
    %c0_i32_1 = arith.constant 0 : i32
    return %c0_i32, %c0_i32_0 : i32, i32
  }
  func.func @transform_7(%arg0: i32, %arg1: i32) -> (i32, i32) {
    %c0_i32 = arith.constant 0 : i32
    %c0_i32_0 = arith.constant 0 : i32
    %c0_i32_1 = arith.constant 0 : i32
    return %c0_i32, %c0_i32_0 : i32, i32
  }
  func.func @transform_8(%arg0: i32, %arg1: i32) -> (i32, i32, i32) {
    %c0_i32 = arith.constant 0 : i32
    %c0_i32_0 = arith.constant 0 : i32
    return %arg0, %arg1, %c0_i32 : i32, i32, i32
  }
}

</mosaic_0001>

<bundles_post_ra>
// kernel: bottleneck_forward.1
= control target key start
LH: loop header
LB: loop body
LE: loop exit
PB: predicated region body
PF: predicated region fallthrough
CT: control target
= control target key end

     0   :  { %s6733_s27 = smov 0   ;;  %s6735_s28 = smov 0   ;;  %s8194_s0 = inlined_call_operand.vmem [shape: bf16[2,4,256,128], index: 0, kind: input, shape index: {}]   ;;  %s8195_s1 = inlined_call_operand.vmem [shape: bf16[3,3,128,128], index: 1, kind: input, shape index: {}]   ;;  %s8196_s2 = inlined_call_operand.vmem [shape: f32[1,128], index: 2, kind: input, shape index: {}]   ;;  %s8197_s3 = inlined_call_operand.vmem [shape: f32[1,128], index: 3, kind: input, shape index: {}]   ;;  %s8198_s4 = inlined_call_operand.vmem [shape: bf16[3,3,128,128], index: 4, kind: input, shape index: {}]   ;;  %s8199_s5 = inlined_call_operand.vmem [shape: f32[1,128], index: 5, kind: input, shape index: {}]   ;;  %s8200_s6 = inlined_call_operand.vmem [shape: f32[1,128], index: 6, kind: input, shape index: {}]   ;;  %s8201_s7 = inlined_call_operand.vmem [shape: f32[32,128], index: 7, kind: input, shape index: {}]   ;;  %s8202_s8 = inlined_call_operand.vmem [shape: bf16[2,512,128], index: 8, kind: output, shape index: {}]  }
   0x1   :  { %s6737_s29 = smov 0   ;;  %s6739_s30 = smov 0  }
   0x2   :  { %s6741_s9 = smov 0  }
   0x3 LB: > { %s27_s10 = sadd.s32 1, %s6676_s29  ;;  %s30_s11 = sadd.s32 1, %s6680_s30  ;;  %s6684_s9 = sphi %s6741_s9, %s18_s9   ;;  %s6680_s30 = sphi %s6739_s30, %s8206_s30   ;;  %s6676_s29 = sphi %s6737_s29, %s8205_s29   ;;  %s6672_s28 = sphi %s6735_s28, %s8204_s28   ;;  %s6668_s27 = sphi %s6733_s27, %s8203_s27  }
   0x4   : > { %p28_p0 = scmp.ge.s32.totalorder %s27_s10, 4  ;;  %p4646_p1 = scmp.ge.s32.totalorder %s6684_s9, 1 }
   0x5   : > { %p282_p2 = scmp.lt.s32.totalorder %s6684_s9, 9 }
   0x6   : > { %s8208_s10 = smov (%p28_p0, %s27_s10), 0  ;;  %s8210_s11 = smov (!%p28_p0, %s30_s11), %s6680_s30 }
   0x7   : > { %p283_p3 = pnand %p4646_p1, %p282_p2  ;;  %p32_p4 = scmp.ge.s32.totalorder %s8210_s11, 2 }
   0x8   : > { %v6476_v0 = vld [vmem:[%s8195_s1 + $0xc0] sm:$0xff] (!%p283_p3)   ;;  %p324_p5 = scmp.lt.s32.totalorder (!%p283_p3), %s6672_s28, 1  ;;  %p326_p6 = scmp.lt.s32.totalorder (!%p283_p3), %s6668_s27, 3  ;;  %v6478_v2 = vld [vmem:[%s8195_s1 + $0xc8] sm:$0xff] (!%p283_p3)   ;;  %v6480_v4 = vld [vmem:[%s8195_s1 + $0xd0] sm:$0xff] (!%p283_p3)  }
   0x9   : > { %s8212_s11 = smov (%p32_p4, %s8210_s11), 0  ;;  %286 = sbr.rel (%p283_p3) target bundleno = 1041 (0x411), region = 52 }
   0xa   : > { %v6477_v1 = vld [vmem:[%s8195_s1 + $0x100] sm:$0xff] (!%p283_p3)   ;;  %5530 = vmatprep.subr.bf16.mxu0 (!%p283_p3), %v6476_v0  ;;  %v6479_v3 = vld [vmem:[%s8195_s1 + $0x108] sm:$0xff] (!%p283_p3)   ;;  %v6481_v5 = vld [vmem:[%s8195_s1 + $0x110] sm:$0xff] (!%p283_p3)   ;;  %s4650_s13 = sshll.u32 (!%p283_p3), %s6668_s27, 4  ;;  %p4881_p8 = scmp.ne.s32.totalorder (!%p283_p3), %s6668_s27, 0 }
   0xb   : > { %5531 = vmatpush3.bf16.msra.mxu0 (!%p283_p3), %v6476_v0  ;;  %5650 = vmatprep.subr.bf16.mxu1 (!%p283_p3), %v6477_v1  ;;  %v6482_v6 = vld [vmem:[%s8195_s1 + $0xd8] sm:$0xff] (!%p283_p3)   ;;  %p336_p7 = scmp.lt.s32.totalorder (!%p283_p3), %s4650_s13, 63  ;;  %v6484_v8 = vld [vmem:[%s8195_s1 + $0xe0] sm:$0xff] (!%p283_p3)   ;;  %v6486_v11 = vld [vmem:[%s8195_s1 + $0xe8] sm:$0xff] (!%p283_p3)  }
   0xc   : > { %5532 = vmatprep.subr.bf16.mxu0 (!%p283_p3), %v6478_v2  ;;  %5651 = vmatpush3.bf16.msra.mxu1 (!%p283_p3), %v6477_v1  ;;  %v6483_v7 = vld [vmem:[%s8195_s1 + $0x118] sm:$0xff] (!%p283_p3)   ;;  %v6485_v9 = vld [vmem:[%s8195_s1 + $0x120] sm:$0xff] (!%p283_p3)   ;;  %v6487_v12 = vld [vmem:[%s8195_s1 + $0x128] sm:$0xff] (!%p283_p3)  }
   0xd   : > { %5652 = vmatprep.subr.bf16.mxu1 (!%p283_p3), %v6479_v3  ;;  %v6488_v13 = vld [vmem:[%s8195_s1 + $0xf0] sm:$0xff] (!%p283_p3)   ;;  %v6490_v15 = vld [vmem:[%s8195_s1 + $0xf8] sm:$0xff] (!%p283_p3)   ;;  %v6494_v17 = vld [vmem:[%s8195_s1] sm:$0xff] (!%p283_p3)  }
   0xe   : > { %v6489_v14 = vld [vmem:[%s8195_s1 + $0x130] sm:$0xff] (!%p283_p3)   ;;  %v6492_v16 = vld [vmem:[%s8195_s1 + $0x138] sm:$0xff] (!%p283_p3)   ;;  %v6502_v18 = vld [vmem:[%s8195_s1 + $0x40] sm:$0xff] (!%p283_p3)  }
   0xf   : > { %5533 = vmatpush3.bf16.msra.mxu0 (!%p283_p3), %v6478_v2  ;;  %v6495_v20 = vld [vmem:[%s8195_s1 + $0x8] sm:$0xff] (!%p283_p3)   ;;  %v6498_v23 = vld [vmem:[%s8195_s1 + $0x10] sm:$0xff] (!%p283_p3)   ;;  %v6501_v27 = vld [vmem:[%s8195_s1 + $0x18] sm:$0xff] (!%p283_p3)  }
  0x10   : > { %s8214_s28 = smov (!%p324_p5, %s6672_s28), 1  ;;  %5534 = vmatprep.subr.bf16.mxu0 %v6480_v4  ;;  %5653 = vmatpush3.bf16.msra.mxu1 %v6479_v3  ;;  %s8216_s13 = smov (!%p336_p7, %s4650_s13), 63  ;;  %v6504_v22 = vld [vmem:[%s8195_s1 + $0x48] sm:$0xff]   ;;  %v6507_v25 = vld [vmem:[%s8195_s1 + $0x50] sm:$0xff]   ;;  %v6510_v28 = vld [vmem:[%s8195_s1 + $0x58] sm:$0xff]  }
  0x11   : > { %s327_s20 = scalar_select %p326_p6, %s6668_s27, 3  ;;  %5654 = vmatprep.subr.bf16.mxu1 %v6481_v5  ;;  %v6506_v29 = vld [vmem:[%s8195_s1 + $0x20] sm:$0xff]   ;;  %v6508_v33 = vld [vmem:[%s8195_s1 + $0x28] sm:$0xff]   ;;  %v6513_v36 = vld [vmem:[%s8195_s1 + $0x30] sm:$0xff]  }
  0x12   : > { %s4648_s23 = sshll.u32 %s8214_s28, 7  ;;  %s4651_s19 = sshll.u32 %s8214_s28, 6  ;;  %v6512_v31 = vld [vmem:[%s8195_s1 + $0x60] sm:$0xff]   ;;  %v6515_v34 = vld [vmem:[%s8195_s1 + $0x68] sm:$0xff]   ;;  %v6518_v37 = vld [vmem:[%s8195_s1 + $0x70] sm:$0xff]  }
  0x13   : > { %s4647_s26 = sshll.u32 %s327_s20, 5  ;;  %5535 = vmatpush3.bf16.msra.mxu0 %v6480_v4  ;;  %s339_s25 = sadd.s32 %s4651_s19, %s8216_s13  ;;  %v6517_v39 = vld [vmem:[%s8195_s1 + $0x38] sm:$0xff]   ;;  %v6522_v42 = vld [vmem:[%s8195_s1 + $0x180] sm:$0xff]   ;;  %v6523_v48 = vld [vmem:[%s8195_s1 + $0x188] sm:$0xff]  }
  0x14   : > { %s330_s12 = sadd.s32 %s4648_s23, %s4647_s26  ;;  %5536 = vmatprep.subr.bf16.mxu0 %v6482_v6  ;;  %5655 = vmatpush3.bf16.msra.mxu1 %v6481_v5  ;;  %s4652_s28 = sshll.u32 %s339_s25, 2  ;;  %v6520_v40 = vld [vmem:[%s8195_s1 + $0x78] sm:$0xff]   ;;  %v6526_v43 = vld [vmem:[%s8195_s1 + $0x1c0] sm:$0xff]   ;;  %v6527_v49 = vld [vmem:[%s8195_s1 + $0x1c8] sm:$0xff]  }
  0x15   : > { %s4649_s18 = sshll.u32 %s330_s12, 2  ;;  %5656 = vmatprep.subr.bf16.mxu1 %v6483_v7  ;;  %s6810_s16 = scalar_lea.vmem %s8202_s8, %s4652_s28  ;;  %v6524_v50 = vld [vmem:[%s8195_s1 + $0x190] sm:$0xff]   ;;  %v6525_v52 = vld [vmem:[%s8195_s1 + $0x198] sm:$0xff]   ;;  %v6528_v53 = vld [vmem:[%s8195_s1 + $0x1a0] sm:$0xff]  }
  0x16   : > { %s6802_s24 = scalar_lea.vmem %s8194_s0, %s4649_s18  ;;  %v6529_v51 = vld [vmem:[%s8195_s1 + $0x1d0] sm:$0xff]   ;;  %v6531_v54 = vld [vmem:[%s8195_s1 + $0x1d8] sm:$0xff]   ;;  %v6532_v55 = vld [vmem:[%s8195_s1 + $0x1e0] sm:$0xff]  }
  0x17   : > { %5537 = vmatpush3.bf16.msra.mxu0 %v6482_v6  ;;  %v6813_v10 = vld [vmem:[%s6802_s24 + $0x10] sm:$0xff]   ;;  %v6842_v19 = vld [vmem:[%s6802_s24 + $0x18] sm:$0xff]   ;;  %v6848_v21 = vld [vmem:[%s6802_s24 + $0x20] sm:$0xff]  }
  0x18   : > { %5538 = vmatprep.subr.bf16.mxu0 %v6484_v8  ;;  %5657 = vmatpush3.bf16.msra.mxu1 %v6483_v7  ;;  %v6860_v24 = vld [vmem:[%s6802_s24 + $0x28] sm:$0xff]   ;;  %v6867_v26 = vld [vmem:[%s6802_s24 + $0x30] sm:$0xff]   ;;  %v6882_v30 = vld [vmem:[%s6802_s24 + $0x38] sm:$0xff]  }
  0x19   : > { %5658 = vmatprep.subr.bf16.mxu1 %v6485_v9  ;;  %5546 = vmatprep.mubr.bf16.mxu0 %v6813_v10  ;;  %v6889_v32 = vld [vmem:[%s6802_s24 + $0x40] sm:$0xff]   ;;  %v6901_v35 = vld [vmem:[%s6802_s24 + $0x48] sm:$0xff]   ;;  %v6911_v38 = vld [vmem:[%s6802_s24 + $0x50] sm:$0xff]  }
  0x1a   : > { %5666 = vmatprep.mubr.bf16.mxu1 %v6813_v10  ;;  %v6923_v41 = vld [vmem:[%s6802_s24 + $0x58] sm:$0xff]   ;;  %v6933_v44 = vld [vmem:[%s6802_s24 + $0x60] sm:$0xff]   ;;  %v6940_v45 = vld [vmem:[%s6802_s24 + $0x68] sm:$0xff]  }
  0x1b   : > { %5539 = vmatpush3.bf16.msra.mxu0 %v6484_v8  ;;  %v6943_v46 = vld [vmem:[%s6802_s24] sm:$0xff]   ;;  %v6950_v47 = vld [vmem:[%s6802_s24 + $0x8] sm:$0xff]   ;;  %v6533_v58 = vld [vmem:[%s8195_s1 + $0x1b0] sm:$0xff]  }
  0x1c   : > { %5540 = vmatprep.subr.bf16.mxu0 %v6486_v11  ;;  %5659 = vmatpush3.bf16.msra.mxu1 %v6485_v9  ;;  %v6530_v56 = vld [vmem:[%s8195_s1 + $0x1a8] sm:$0xff]   ;;  %v6536_v59 = vld [vmem:[%s8195_s1 + $0x1f0] sm:$0xff]   ;;  %v6535_v60 = vld [vmem:[%s8195_s1 + $0x1b8] sm:$0xff]  }
  0x1d   : > { %5660 = vmatprep.subr.bf16.mxu1 %v6487_v12  ;;  %v6534_v57 = vld [vmem:[%s8195_s1 + $0x1e8] sm:$0xff]   ;;  %v6538_v61 = vld [vmem:[%s8195_s1 + $0x1f8] sm:$0xff]   ;;  %v6540_v62 = vld [vmem:[%s8195_s1 + $0x140] sm:$0xff]  }
  0x1e   : > { %v7018_v63 = vld [vmem:[%s6802_s24 + $0x20] sm:$0xff]   ;;  %v7025_v0 = vld [vmem:[%s6802_s24 + $0x28] sm:$0xff]   ;;  %v7031_v2 = vld [vmem:[%s6802_s24 + $0x30] sm:$0xff]  }
  0x1f   : > { %5541 = vmatpush3.bf16.msra.mxu0 %v6486_v11  ;;  %v6541_v1 = vld [vmem:[%s8195_s1 + $0x148] sm:$0xff]   ;;  %v6544_v3 = vld [vmem:[%s8195_s1 + $0x150] sm:$0xff]   ;;  %v7041_v4 = vld [vmem:[%s6802_s24 + $0x38] sm:$0xff]  }
  0x20   : > { %5542 = vmatprep.subr.bf16.mxu0 %v6488_v13  ;;  %5661 = vmatpush3.bf16.msra.mxu1 %v6487_v12  ;;  %v7044_v5 = vld [vmem:[%s6802_s24 + $0x40] sm:$0xff]   ;;  %v6547_v6 = vld [vmem:[%s8195_s1 + $0x158] sm:$0xff]   ;;  %v7057_v8 = vld [vmem:[%s6802_s24 + $0x48] sm:$0xff]  }
  0x21   : > { %5662 = vmatprep.subr.bf16.mxu1 %v6489_v14  ;;  %v6550_v7 = vld [vmem:[%s8195_s1 + $0x160] sm:$0xff]   ;;  %v7060_v9 = vld [vmem:[%s6802_s24 + $0x50] sm:$0xff]   ;;  %v6551_v11 = vld [vmem:[%s8195_s1 + $0x168] sm:$0xff]  }
  0x22   : > { %v6554_v12 = vld [vmem:[%s8195_s1 + $0x170] sm:$0xff]  }
  0x23   : > { %5543 = vmatpush3.bf16.msra.mxu0 %v6488_v13  ;;  %v7073_v13 = vld [vmem:[%s6802_s24 + $0x58] sm:$0xff]  }
  0x24   : > { %5544 = vmatprep.subr.bf16.mxu0 %v6490_v15  ;;  %5663 = vmatpush3.bf16.msra.mxu1 %v6489_v14  ;;  %v7076_v14 = vld [vmem:[%s6802_s24 + $0x60] sm:$0xff]  }
  0x25   : > { %5664 = vmatprep.subr.bf16.mxu1 %v6492_v16 }
  0x27   : > { %5545 = vmatpush3.bf16.msra.mxu0 %v6490_v15  ;;  %v6557_v15 = vld [vmem:[%s8195_s1 + $0x178] sm:$0xff]  }
  0x28   : > { %5570 = vmatprep.subr.bf16.mxu0 %v6494_v17  ;;  %5665 = vmatpush3.bf16.msra.mxu1 %v6492_v16  ;;  %v6558_v16 = vld [vmem:[%s8195_s1 + $0x80] sm:$0xff]  }
  0x29   : > { %5690 = vmatprep.subr.bf16.mxu1 %v6502_v18 }
  0x2a   : > { %5547 = vmatmul.mubr.bf16.vlgmr.msra.gmra.mrb[0].mxu0 %v6842_v19 }
  0x2b   : > { %5571 = vmatpush3.bf16.msra.mxu0 %v6494_v17  ;;  %5667 = vmatmul.mubr.bf16.vlgmr.msra.gmra.mrb[0].mxu1 %v6842_v19  ;;  %v7089_v17 = vld [vmem:[%s6802_s24 + $0x68] sm:$0xff]  }
  0x2c   : > { %5572 = vmatprep.subr.bf16.mxu0 %v6495_v20  ;;  %5550 = vmatprep.mubr.bf16.mxu0 %v6848_v21 }
  0x2d   : > { %5670 = vmatprep.mubr.bf16.mxu1 %v6848_v21  ;;  %5691 = vmatpush3.bf16.msra.mxu1 %v6502_v18  ;;  %v7092_v18 = vld [vmem:[%s6802_s24 + $0x70] sm:$0xff]  }
  0x2e   : > { %5692 = vmatprep.subr.bf16.mxu1 %v6504_v22 }
  0x2f   : > { %5573 = vmatpush3.bf16.msra.mxu0 %v6495_v20  ;;  %v7099_v20 = vld [vmem:[%s6802_s24 + $0x78] sm:$0xff]  }
  0x30   : > { %5574 = vmatprep.subr.bf16.mxu0 %v6498_v23 }
  0x31   : > { %5693 = vmatpush3.bf16.msra.mxu1 %v6504_v22  ;;  %v6559_v22 = vld [vmem:[%s8195_s1 + $0x88] sm:$0xff]  }
  0x32   : > { %5551 = vmatmul.mubr.bf16.gmra.mrb[4].mxu0 %v6860_v24  ;;  %5694 = vmatprep.subr.bf16.mxu1 %v6507_v25 }
  0x33   : > { %5671 = vmatmul.mubr.bf16.gmra.mrb[4].mxu1 %v6860_v24  ;;  %5575 = vmatpush3.bf16.msra.mxu0 %v6498_v23  ;;  %v6560_v23 = vld [vmem:[%s8195_s1 + $0x90] sm:$0xff]  }
  0x34   : > { %5554 = vmatprep.mubr.bf16.mxu0 %v6867_v26  ;;  %5576 = vmatprep.subr.bf16.mxu0 %v6501_v27 }
  0x35   : > { %5674 = vmatprep.mubr.bf16.mxu1 %v6867_v26  ;;  %5695 = vmatpush3.bf16.msra.mxu1 %v6507_v25  ;;  %v6561_v25 = vld [vmem:[%s8195_s1 + $0x98] sm:$0xff]  }
  0x36   : > { %5696 = vmatprep.subr.bf16.mxu1 %v6510_v28 }
  0x37   : > { %5577 = vmatpush3.bf16.msra.mxu0 %v6501_v27  ;;  %v6562_v27 = vld [vmem:[%s8195_s1 + $0xa0] sm:$0xff]  }
  0x38   : > { %5578 = vmatprep.subr.bf16.mxu0 %v6506_v29 }
  0x39   : > { %5697 = vmatpush3.bf16.msra.mxu1 %v6510_v28  ;;  %v6563_v28 = vld [vmem:[%s8195_s1 + $0xa8] sm:$0xff]  }
  0x3a   : > { %5555 = vmatmul.mubr.bf16.gmra.mrb[8].mxu0 %v6882_v30  ;;  %5698 = vmatprep.subr.bf16.mxu1 %v6512_v31 }
  0x3b   : > { %5675 = vmatmul.mubr.bf16.gmra.mrb[8].mxu1 %v6882_v30  ;;  %5558 = vmatprep.mubr.bf16.mxu0 %v6889_v32 }
  0x3c   : > { %5579 = vmatpush3.bf16.msra.mxu0 %v6506_v29  ;;  %5678 = vmatprep.mubr.bf16.mxu1 %v6889_v32  ;;  %v6564_v29 = vld [vmem:[%s8195_s1 + $0xb0] sm:$0xff]  }
  0x3d   : > { %5580 = vmatprep.subr.bf16.mxu0 %v6508_v33  ;;  %5699 = vmatpush3.bf16.msra.mxu1 %v6512_v31  ;;  %v6565_v31 = vld [vmem:[%s8195_s1 + $0xb8] sm:$0xff]  }
  0x3e   : > { %5700 = vmatprep.subr.bf16.mxu1 %v6515_v34 }
  0x40   : > { %5581 = vmatpush3.bf16.msra.mxu0 %v6508_v33  ;;  %v6566_v33 = vld [vmem:[%s8195_s1 + $0x200] sm:$0xff]  }
  0x41   : > { %5582 = vmatprep.subr.bf16.mxu0 %v6513_v36  ;;  %5701 = vmatpush3.bf16.msra.mxu1 %v6515_v34  ;;  %v6567_v34 = vld [vmem:[%s8195_s1 + $0x208] sm:$0xff]  }
  0x42   : > { %5559 = vmatmul.mubr.bf16.gmra.mrb[12].mxu0 %v6901_v35  ;;  %5702 = vmatprep.subr.bf16.mxu1 %v6518_v37 }
  0x43   : > { %5679 = vmatmul.mubr.bf16.gmra.mrb[12].mxu1 %v6901_v35  ;;  %5562 = vmatprep.mubr.bf16.mxu0 %v6911_v38 }
  0x44   : > { %5682 = vmatprep.mubr.bf16.mxu1 %v6911_v38  ;;  %5583 = vmatpush3.bf16.msra.mxu0 %v6513_v36  ;;  %v6568_v36 = vld [vmem:[%s8195_s1 + $0x210] sm:$0xff]  }
  0x45   : > { %5584 = vmatprep.subr.bf16.mxu0 %v6517_v39  ;;  %5703 = vmatpush3.bf16.msra.mxu1 %v6518_v37  ;;  %v6569_v37 = vld [vmem:[%s8195_s1 + $0x218] sm:$0xff]  }
  0x46   : > { %5704 = vmatprep.subr.bf16.mxu1 %v6520_v40 }
  0x48   : > { %5585 = vmatpush3.bf16.msra.mxu0 %v6517_v39  ;;  %v6571_v39 = vld [vmem:[%s8195_s1 + $0x228] sm:$0xff]  }
  0x49   : > { %5610 = vmatprep.subr.bf16.mxu0 %v6522_v42  ;;  %5705 = vmatpush3.bf16.msra.mxu1 %v6520_v40 }
  0x4a   : > { %5563 = vmatmul.mubr.bf16.gmra.mrb[16].mxu0 %v6923_v41  ;;  %5730 = vmatprep.subr.bf16.mxu1 %v6526_v43 }
  0x4b   : > { %5683 = vmatmul.mubr.bf16.gmra.mrb[16].mxu1 %v6923_v41  ;;  %5566 = vmatprep.mubr.bf16.mxu0 %v6933_v44 }
  0x4c   : > { %5686 = vmatprep.mubr.bf16.mxu1 %v6933_v44 }
  0x52   : > { %5567 = vmatmul.mubr.bf16.gmra.mrb[20].mxu0 %v6940_v45 }
  0x53   : > { %5687 = vmatmul.mubr.bf16.gmra.mrb[20].mxu1 %v6940_v45  ;;  %5586 = vmatprep.mubr.bf16.mxu0 %v6943_v46 }
  0x54   : > { %5706 = vmatprep.mubr.bf16.mxu1 %v6943_v46 }
  0x5a   : > { %5587 = vmatmul.mubr.bf16.vlgmr.msra.gmra.mrb[0].mxu0 %v6950_v47 }
  0x5b   : > { %5611 = vmatpush3.bf16.msra.mxu0 %v6522_v42  ;;  %5707 = vmatmul.mubr.bf16.vlgmr.msra.gmra.mrb[0].mxu1 %v6950_v47 }
  0x5c   : > { %5612 = vmatprep.subr.bf16.mxu0 %v6523_v48  ;;  %5590 = vmatprep.mubr.bf16.mxu0 %v6813_v10 }
  0x5d   : > { %5710 = vmatprep.mubr.bf16.mxu1 %v6813_v10  ;;  %5731 = vmatpush3.bf16.msra.mxu1 %v6526_v43 }
  0x5e   : > { %5732 = vmatprep.subr.bf16.mxu1 %v6527_v49 }
  0x5f   : > { %5613 = vmatpush3.bf16.msra.mxu0 %v6523_v48 }
  0x60   : > { %5614 = vmatprep.subr.bf16.mxu0 %v6524_v50 }
  0x61   : > { %5733 = vmatpush3.bf16.msra.mxu1 %v6527_v49 }
  0x62   : > { %5591 = vmatmul.mubr.bf16.gmra.mrb[4].mxu0 %v6842_v19  ;;  %5734 = vmatprep.subr.bf16.mxu1 %v6529_v51 }
  0x63   : > { %5711 = vmatmul.mubr.bf16.gmra.mrb[4].mxu1 %v6842_v19  ;;  %5615 = vmatpush3.bf16.msra.mxu0 %v6524_v50 }
  0x64   : > { %5594 = vmatprep.mubr.bf16.mxu0 %v6848_v21  ;;  %5616 = vmatprep.subr.bf16.mxu0 %v6525_v52 }
  0x65   : > { %5714 = vmatprep.mubr.bf16.mxu1 %v6848_v21  ;;  %5735 = vmatpush3.bf16.msra.mxu1 %v6529_v51 }
  0x66   : > { %5736 = vmatprep.subr.bf16.mxu1 %v6531_v54 }
  0x67   : > { %5617 = vmatpush3.bf16.msra.mxu0 %v6525_v52 }
  0x68   : > { %5618 = vmatprep.subr.bf16.mxu0 %v6528_v53 }
  0x69   : > { %5737 = vmatpush3.bf16.msra.mxu1 %v6531_v54 }
  0x6a   : > { %5595 = vmatmul.mubr.bf16.gmra.mrb[8].mxu0 %v6860_v24  ;;  %5738 = vmatprep.subr.bf16.mxu1 %v6532_v55 }
  0x6b   : > { %5715 = vmatmul.mubr.bf16.gmra.mrb[8].mxu1 %v6860_v24  ;;  %5598 = vmatprep.mubr.bf16.mxu0 %v6867_v26 }
  0x6c   : > { %5619 = vmatpush3.bf16.msra.mxu0 %v6528_v53  ;;  %5718 = vmatprep.mubr.bf16.mxu1 %v6867_v26 }
  0x6d   : > { %5620 = vmatprep.subr.bf16.mxu0 %v6530_v56  ;;  %5739 = vmatpush3.bf16.msra.mxu1 %v6532_v55 }
  0x6e   : > { %5740 = vmatprep.subr.bf16.mxu1 %v6534_v57 }
  0x70   : > { %5621 = vmatpush3.bf16.msra.mxu0 %v6530_v56 }
  0x71   : > { %5622 = vmatprep.subr.bf16.mxu0 %v6533_v58  ;;  %5741 = vmatpush3.bf16.msra.mxu1 %v6534_v57 }
  0x72   : > { %5599 = vmatmul.mubr.bf16.gmra.mrb[12].mxu0 %v6882_v30  ;;  %5742 = vmatprep.subr.bf16.mxu1 %v6536_v59 }
  0x73   : > { %5719 = vmatmul.mubr.bf16.gmra.mrb[12].mxu1 %v6882_v30  ;;  %5602 = vmatprep.mubr.bf16.mxu0 %v6889_v32 }
  0x74   : > { %5722 = vmatprep.mubr.bf16.mxu1 %v6889_v32  ;;  %5623 = vmatpush3.bf16.msra.mxu0 %v6533_v58 }
  0x75   : > { %5624 = vmatprep.subr.bf16.mxu0 %v6535_v60  ;;  %5743 = vmatpush3.bf16.msra.mxu1 %v6536_v59 }
  0x76   : > { %5744 = vmatprep.subr.bf16.mxu1 %v6538_v61 }
  0x78   : > { %5625 = vmatpush3.bf16.msra.mxu0 %v6535_v60 }
  0x79   : > { %5745 = vmatpush3.bf16.msra.mxu1 %v6538_v61  ;;  %5770 = vmatprep.subr.bf16.mxu0 %v6540_v62 }
  0x7a   : > { %5603 = vmatmul.mubr.bf16.gmra.mrb[16].mxu0 %v6901_v35 }
  0x7b   : > { %5723 = vmatmul.mubr.bf16.gmra.mrb[16].mxu1 %v6901_v35  ;;  %5606 = vmatprep.mubr.bf16.mxu0 %v6911_v38 }
  0x7c   : > { %5726 = vmatprep.mubr.bf16.mxu1 %v6911_v38 }
  0x82   : > { %5607 = vmatmul.mubr.bf16.gmra.mrb[20].mxu0 %v6923_v41 }
  0x83   : > { %5727 = vmatmul.mubr.bf16.gmra.mrb[20].mxu1 %v6923_v41  ;;  %5626 = vmatprep.mubr.bf16.mxu0 %v7018_v63 }
  0x84   : > { %5746 = vmatprep.mubr.bf16.mxu1 %v7018_v63 }
  0x8a   : > { %5627 = vmatmul.mubr.bf16.vlgmr.msra.gmra.mrb[0].mxu0 %v7025_v0 }
  0x8b   : > { %5771 = vmatpush3.bf16.msra.mxu0 %v6540_v62  ;;  %5747 = vmatmul.mubr.bf16.vlgmr.msra.gmra.mrb[0].mxu1 %v7025_v0 }
  0x8c   : > { %5772 = vmatprep.subr.bf16.mxu0 %v6541_v1  ;;  %5630 = vmatprep.mubr.bf16.mxu0 %v7031_v2 }
  0x8d   : > { %5750 = vmatprep.mubr.bf16.mxu1 %v7031_v2 }
  0x8f   : > { %5773 = vmatpush3.bf16.msra.mxu0 %v6541_v1 }
  0x90   : > { %5774 = vmatprep.subr.bf16.mxu0 %v6544_v3 }
  0x92   : > { %5631 = vmatmul.mubr.bf16.gmra.mrb[4].mxu0 %v7041_v4 }
  0x93   : > { %5751 = vmatmul.mubr.bf16.gmra.mrb[4].mxu1 %v7041_v4  ;;  %5775 = vmatpush3.bf16.msra.mxu0 %v6544_v3 }
  0x94   : > { %5634 = vmatprep.mubr.bf16.mxu0 %v7044_v5  ;;  %5754 = vmatprep.mubr.bf16.mxu1 %v7044_v5 }
  0x95   : > { %5776 = vmatprep.subr.bf16.mxu0 %v6547_v6 }
  0x97   : > { %5777 = vmatpush3.bf16.msra.mxu0 %v6547_v6 }
  0x98   : > { %5778 = vmatprep.subr.bf16.mxu0 %v6550_v7 }
  0x9a   : > { %5635 = vmatmul.mubr.bf16.gmra.mrb[8].mxu0 %v7057_v8 }
  0x9b   : > { %5755 = vmatmul.mubr.bf16.gmra.mrb[8].mxu1 %v7057_v8  ;;  %5638 = vmatprep.mubr.bf16.mxu0 %v7060_v9 }
  0x9c   : > { %5779 = vmatpush3.bf16.msra.mxu0 %v6550_v7  ;;  %5758 = vmatprep.mubr.bf16.mxu1 %v7060_v9 }
  0x9d   : > { %5780 = vmatprep.subr.bf16.mxu0 %v6551_v11 }
  0xa0   : > { %5781 = vmatpush3.bf16.msra.mxu0 %v6551_v11 }
  0xa1   : > { %5782 = vmatprep.subr.bf16.mxu0 %v6554_v12 }
  0xa2   : > { %5639 = vmatmul.mubr.bf16.gmra.mrb[12].mxu0 %v7073_v13 }
  0xa3   : > { %5759 = vmatmul.mubr.bf16.gmra.mrb[12].mxu1 %v7073_v13  ;;  %5642 = vmatprep.mubr.bf16.mxu0 %v7076_v14 }
  0xa4   : > { %5762 = vmatprep.mubr.bf16.mxu1 %v7076_v14  ;;  %5783 = vmatpush3.bf16.msra.mxu0 %v6554_v12 }
  0xa5   : > { %5784 = vmatprep.subr.bf16.mxu0 %v6557_v15 }
  0xa8   : > { %5785 = vmatpush3.bf16.msra.mxu0 %v6557_v15 }
  0xa9   : > { %5810 = vmatprep.subr.bf16.mxu0 %v6558_v16 }
  0xaa   : > { %5643 = vmatmul.mubr.bf16.gmra.mrb[16].mxu0 %v7089_v17 }
  0xab   : > { %5763 = vmatmul.mubr.bf16.gmra.mrb[16].mxu1 %v7089_v17  ;;  %5646 = vmatprep.mubr.bf16.mxu0 %v7092_v18 }
  0xac   : > { %5766 = vmatprep.mubr.bf16.mxu1 %v7092_v18 }
  0xb2   : > { %5647 = vmatmul.mubr.bf16.gmra.mrb[20].mxu0 %v7099_v20 }
  0xb3   : > { %5767 = vmatmul.mubr.bf16.gmra.mrb[20].mxu1 %v7099_v20  ;;  %5786 = vmatprep.mubr.bf16.mxu0 %v6813_v10 }
  0xba   : > { %5787 = vmatmul.mubr.bf16.vlgmr.msra.gmra.mrb[24].mxu0 %v6842_v19 }
  0xbb   : > { %5811 = vmatpush3.bf16.msra.mxu0 %v6558_v16  ;;  %5790 = vmatprep.mubr.bf16.mxu0 %v6848_v21 }
  0xbc   : > { %5812 = vmatprep.subr.bf16.mxu0 %v6559_v22 }
  0xbf   : > { %5813 = vmatpush3.bf16.msra.mxu0 %v6559_v22 }
  0xc0   : > { %5814 = vmatprep.subr.bf16.mxu0 %v6560_v23 }
  0xc2   : > { %5791 = vmatmul.mubr.bf16.gmra.mrb[28].mxu0 %v6860_v24 }
  0xc3   : > { %5815 = vmatpush3.bf16.msra.mxu0 %v6560_v23  ;;  %5794 = vmatprep.mubr.bf16.mxu0 %v6867_v26 }
  0xc4   : > { %5816 = vmatprep.subr.bf16.mxu0 %v6561_v25 }
  0xc7   : > { %5817 = vmatpush3.bf16.msra.mxu0 %v6561_v25 }
  0xc8   : > { %5818 = vmatprep.subr.bf16.mxu0 %v6562_v27 }
  0xca   : > { %5795 = vmatmul.mubr.bf16.gmra.mrb[32].mxu0 %v6882_v30 }
  0xcb   : > { %5798 = vmatprep.mubr.bf16.mxu0 %v6889_v32  ;;  %5819 = vmatpush3.bf16.msra.mxu0 %v6562_v27 }
  0xcc   : > { %5820 = vmatprep.subr.bf16.mxu0 %v6563_v28 }
  0xcf   : > { %5821 = vmatpush3.bf16.msra.mxu0 %v6563_v28 }
  0xd0   : > { %5822 = vmatprep.subr.bf16.mxu0 %v6564_v29 }
  0xd2   : > { %5799 = vmatmul.mubr.bf16.gmra.mrb[36].mxu0 %v6901_v35 }
  0xd3   : > { %5802 = vmatprep.mubr.bf16.mxu0 %v6911_v38  ;;  %5823 = vmatpush3.bf16.msra.mxu0 %v6564_v29 }
  0xd4   : > { %5824 = vmatprep.subr.bf16.mxu0 %v6565_v31 }
  0xd7   : > { %5825 = vmatpush3.bf16.msra.mxu0 %v6565_v31 }
  0xd8   : > { %5850 = vmatprep.subr.bf16.mxu0 %v6566_v33 }
  0xda   : > { %5803 = vmatmul.mubr.bf16.gmra.mrb[40].mxu0 %v6923_v41 }
  0xdb   : > { %5806 = vmatprep.mubr.bf16.mxu0 %v6933_v44 }
  0xe2   : > { %5807 = vmatmul.mubr.bf16.gmra.mrb[44].mxu0 %v6940_v45 }
  0xe3   : > { %5826 = vmatprep.mubr.bf16.mxu0 %v6943_v46 }
  0xea   : > { %5827 = vmatmul.mubr.bf16.vlgmr.msra.gmra.mrb[24].mxu0 %v6950_v47 }
  0xeb   : > { %5851 = vmatpush3.bf16.msra.mxu0 %v6566_v33  ;;  %5830 = vmatprep.mubr.bf16.mxu0 %v6813_v10  ;;  %v6570_v10 = vld [vmem:[%s8195_s1 + $0x220] sm:$0xff]  }
  0xec   : > { %5852 = vmatprep.subr.bf16.mxu0 %v6567_v34 }
  0xef   : > { %5853 = vmatpush3.bf16.msra.mxu0 %v6567_v34 }
  0xf0   : > { %5854 = vmatprep.subr.bf16.mxu0 %v6568_v36 }
  0xf2   : > { %5831 = vmatmul.mubr.bf16.gmra.mrb[28].mxu0 %v6842_v19  ;;  %v6572_v19 = vld [vmem:[%s8195_s1 + $0x230] sm:$0xff]  }
  0xf3   : > { %5855 = vmatpush3.bf16.msra.mxu0 %v6568_v36  ;;  %5834 = vmatprep.mubr.bf16.mxu0 %v6848_v21  ;;  %v6573_v21 = vld [vmem:[%s8195_s1 + $0x238] sm:$0xff]  }
  0xf4   : > { %5856 = vmatprep.subr.bf16.mxu0 %v6569_v37 }
  0xf7   : > { %5857 = vmatpush3.bf16.msra.mxu0 %v6569_v37 }
  0xf8   : > { %5858 = vmatprep.subr.bf16.mxu0 %v6570_v10 }
  0xfa   : > { %5835 = vmatmul.mubr.bf16.gmra.mrb[32].mxu0 %v6860_v24  ;;  %v1181_v24 = vlaneseq }
  0xfb   : > { %5838 = vmatprep.mubr.bf16.mxu0 %v6867_v26  ;;  %5859 = vmatpush3.bf16.msra.mxu0 %v6570_v10 }
  0xfc   : > { %5860 = vmatprep.subr.bf16.mxu0 %v6571_v39  ;;  %v7184_v26 = vshrl.u32 %v1181_v24, 7 }
  0xfe   : > { %vm1183_vm0 = vcmp.lt.s32.totalorder %v7184_v26, 1  ;;  %vm2492_vm1 = vcmp.lt.s32.totalorder %v7184_v26, 7 }
  0xff   : > { %5861 = vmatpush3.bf16.msra.mxu0 %v6571_v39 }
 0x100   : > { %5862 = vmatprep.subr.bf16.mxu0 %v6572_v19 }
 0x102   : > { %5839 = vmatmul.mubr.bf16.gmra.mrb[36].mxu0 %v6882_v30 }
 0x103   : > { %5842 = vmatprep.mubr.bf16.mxu0 %v6889_v32  ;;  %5863 = vmatpush3.bf16.msra.mxu0 %v6572_v19 }
 0x104   : > { %5864 = vmatprep.subr.bf16.mxu0 %v6573_v21 }
 0x107   : > { %5865 = vmatpush3.bf16.msra.mxu0 %v6573_v21 }
 0x10a   : > { %5843 = vmatmul.mubr.bf16.gmra.mrb[40].mxu0 %v6901_v35 }
 0x10b   : > { %5846 = vmatprep.mubr.bf16.mxu0 %v6911_v38 }
 0x112   : > { %5847 = vmatmul.mubr.bf16.gmra.mrb[44].mxu0 %v6923_v41 }
 0x113   : > { %5866 = vmatprep.mubr.bf16.mxu0 %v7018_v63 }
 0x11a   : > { %5867 = vmatmul.mubr.bf16.vlgmr.msra.gmra.mrb[24].mxu0 %v7025_v0 }
 0x11b   : > { %5870 = vmatprep.mubr.bf16.mxu0 %v7031_v2 }
 0x122   : > { %5871 = vmatmul.mubr.bf16.gmra.mrb[28].mxu0 %v7041_v4 }
 0x123   : > { %5874 = vmatprep.mubr.bf16.mxu0 %v7044_v5 }
 0x12a   : > { %5875 = vmatmul.mubr.bf16.gmra.mrb[32].mxu0 %v7057_v8 }
 0x12b   : > { %5878 = vmatprep.mubr.bf16.mxu0 %v7060_v9 }
 0x132   : > { %5879 = vmatmul.mubr.bf16.gmra.mrb[36].mxu0 %v7073_v13 }
 0x133   : > { %5882 = vmatprep.mubr.bf16.mxu0 %v7076_v14 }
 0x13a   : > { %5883 = vmatmul.mubr.bf16.gmra.mrb[40].mxu0 %v7089_v17 }
 0x13b   : > { %5886 = vmatprep.mubr.bf16.mxu0 %v7092_v18 }
 0x142   : > { %5887 = vmatmul.mubr.bf16.gmra.mrb[44].mxu0 %v7099_v20 }
 0x15d   : > { %v5628_v30 = vpop.f32.mrb[0].mxu0 }
 0x15e   : > { %v7186_v32 = vpop.f32.mrb[1].mxu0  ;;  %v5748_v35 = vpop.f32.mrb[0].mxu1  ;;  %v1159_v41 = vrot.slane %v5628_v30, 7 }
 0x15f   : > { %v5629_v38 = vpop.f32.mrb[2].mxu0  ;;  %v7189_v40 = vpop.f32.mrb[1].mxu1  ;;  %v1157_v45 = vrot.slane %v7186_v32, 7 }
 0x160   : > { %v1160_v42 = vrot.slane %v5629_v38, 7  ;;  %v1041_v43 = vpop.f32.mrb[3].mxu0  ;;  %v5749_v44 = vpop.f32.mrb[2].mxu1 }
 0x161   : > { %v1158_v46 = vrot.slane %v1041_v43, 7  ;;  %v1722_v47 = vpop.f32.mrb[3].mxu1 }
 0x162   : > { %v1204_v48 = vsel %vm1183_vm0, %v1159_v41, %v1160_v42 }
 0x163   : > { %v1205_v49 = vsel %vm1183_vm0, %v1158_v46, %v1159_v41  ;;  %v7196_v50 = vadd.f32 %v5749_v44, %v1204_v48  ;;  %v1206_v51 = vsel %vm1183_vm0, %v1157_v45, %v1158_v46 }
 0x164   : > { %v7202_v52 = vadd.f32 %v5748_v35, %v1205_v49  ;;  %v7204_v53 = vadd.f32 %v1722_v47, %v1206_v51 }
 0x165   : > { %v5632_v54 = vpop.f32.mrb[4].mxu0 }
 0x166   : > { %v1054_v55 = vpop.f32.mrb[5].mxu0  ;;  %v5752_v56 = vpop.f32.mrb[4].mxu1  ;;  %v1163_v60 = vrot.slane %v5632_v54, 7 }
 0x167   : > { %v1161_v57 = vrot.slane %v1054_v55, 7  ;;  %v5633_v58 = vpop.f32.mrb[6].mxu0  ;;  %v1735_v59 = vpop.f32.mrb[5].mxu1 }
 0x168   : > { %v1164_v61 = vrot.slane %v5633_v58, 7  ;;  %v1057_v62 = vpop.f32.mrb[7].mxu0  ;;  %v5753_v63 = vpop.f32.mrb[6].mxu1 }
 0x169   : > { %v1162_v0 = vrot.slane %v1057_v62, 7  ;;  %v1203_v1 = vsel %vm1183_vm0, %v1160_v42, %v1161_v57  ;;  %v1738_v2 = vpop.f32.mrb[7].mxu1 }
 0x16a   : > { %v7208_v3 = vadd.f32 %v1735_v59, %v1203_v1  ;;  %v1200_v4 = vsel %vm1183_vm0, %v1163_v60, %v1164_v61 }
 0x16b   : > { %v1201_v5 = vsel %vm1183_vm0, %v1162_v0, %v1163_v60  ;;  %v7214_v6 = vadd.f32 %v5753_v63, %v1200_v4  ;;  %v1202_v7 = vsel %vm1183_vm0, %v1161_v57, %v1162_v0 }
 0x16c   : > { %v7218_v8 = vadd.f32 %v5752_v56, %v1201_v5  ;;  %v7220_v9 = vadd.f32 %v1738_v2, %v1202_v7 }
 0x16d   : > { %v5636_v11 = vpop.f32.mrb[8].mxu0 }
 0x16e   : > { %v1070_v12 = vpop.f32.mrb[9].mxu0  ;;  %v5756_v13 = vpop.f32.mrb[8].mxu1  ;;  %v1167_v17 = vrot.slane %v5636_v11, 7 }
 0x16f   : > { %v1165_v14 = vrot.slane %v1070_v12, 7  ;;  %v5637_v15 = vpop.f32.mrb[10].mxu0  ;;  %v1751_v16 = vpop.f32.mrb[9].mxu1 }
 0x170   : > { %v1168_v18 = vrot.slane %v5637_v15, 7  ;;  %v1073_v20 = vpop.f32.mrb[11].mxu0  ;;  %v5757_v22 = vpop.f32.mrb[10].mxu1 }
 0x171   : > { %v1166_v23 = vrot.slane %v1073_v20, 7  ;;  %v1199_v25 = vsel %vm1183_vm0, %v1164_v61, %v1165_v14  ;;  %v1754_v27 = vpop.f32.mrb[11].mxu1 }
 0x172   : > { %v7224_v28 = vadd.f32 %v1751_v16, %v1199_v25  ;;  %v1196_v29 = vsel %vm1183_vm0, %v1167_v17, %v1168_v18 }
 0x173   : > { %v1197_v31 = vsel %vm1183_vm0, %v1166_v23, %v1167_v17  ;;  %v7230_v33 = vadd.f32 %v5757_v22, %v1196_v29  ;;  %v1198_v34 = vsel %vm1183_vm0, %v1165_v14, %v1166_v23 }
 0x174   : > { %v7234_v36 = vadd.f32 %v5756_v13, %v1197_v31  ;;  %v7236_v37 = vadd.f32 %v1754_v27, %v1198_v34 }
 0x175   : > { %v5640_v10 = vpop.f32.mrb[12].mxu0 }
 0x176   : > { %v1086_v39 = vpop.f32.mrb[13].mxu0  ;;  %v5760_v19 = vpop.f32.mrb[12].mxu1  ;;  %v1171_v35 = vrot.slane %v5640_v10, 7 }
 0x177   : > { %v1169_v21 = vrot.slane %v1086_v39, 7  ;;  %v5641_v24 = vpop.f32.mrb[14].mxu0  ;;  %v1767_v30 = vpop.f32.mrb[13].mxu1 }
 0x178   : > { %v1172_v38 = vrot.slane %v5641_v24, 7  ;;  %v1089_v41 = vpop.f32.mrb[15].mxu0  ;;  %v5761_v42 = vpop.f32.mrb[14].mxu1 }
 0x179   : > { %v1170_v43 = vrot.slane %v1089_v41, 7  ;;  %v1195_v44 = vsel %vm1183_vm0, %v1168_v18, %v1169_v21  ;;  %v1770_v46 = vpop.f32.mrb[15].mxu1 }
 0x17a   : > { %v7240_v47 = vadd.f32 %v1767_v30, %v1195_v44  ;;  %v1192_v48 = vsel %vm1183_vm0, %v1171_v35, %v1172_v38 }
 0x17b   : > { %v1193_v49 = vsel %vm1183_vm0, %v1170_v43, %v1171_v35  ;;  %v7246_v51 = vadd.f32 %v5761_v42, %v1192_v48  ;;  %v1194_v54 = vsel %vm1183_vm0, %v1169_v21, %v1170_v43 }
 0x17c   : > { %v7250_v55 = vadd.f32 %v5760_v19, %v1193_v49  ;;  %v7252_v56 = vadd.f32 %v1770_v46, %v1194_v54 }
 0x17d   : > { %v5644_v57 = vpop.f32.mrb[16].mxu0 }
 0x17e   : > { %v1102_v58 = vpop.f32.mrb[17].mxu0  ;;  %v5764_v59 = vpop.f32.mrb[16].mxu1  ;;  %v1175_v63 = vrot.slane %v5644_v57, 7 }
 0x17f   : > { %v1173_v60 = vrot.slane %v1102_v58, 7  ;;  %v5645_v61 = vpop.f32.mrb[18].mxu0  ;;  %v1783_v62 = vpop.f32.mrb[17].mxu1 }
 0x180   : > { %v1176_v0 = vrot.slane %v5645_v61, 7  ;;  %v1105_v1 = vpop.f32.mrb[19].mxu0  ;;  %v5765_v2 = vpop.f32.mrb[18].mxu1 }
 0x181   : > { %v1174_v4 = vrot.slane %v1105_v1, 7  ;;  %v1191_v5 = vsel %vm1183_vm0, %v1172_v38, %v1173_v60  ;;  %v1786_v7 = vpop.f32.mrb[19].mxu1 }
 0x182   : > { %v7256_v11 = vadd.f32 %v1783_v62, %v1191_v5  ;;  %v1188_v12 = vsel %vm1183_vm0, %v1175_v63, %v1176_v0 }
 0x183   : > { %v1189_v13 = vsel %vm1183_vm0, %v1174_v4, %v1175_v63  ;;  %v7262_v14 = vadd.f32 %v5765_v2, %v1188_v12  ;;  %v1190_v15 = vsel %vm1183_vm0, %v1173_v60, %v1174_v4  ;;  %v7300_v60 = vld [vmem:[%s8196_s2] ss:$0 sm:$0xff] }
 0x184   : > { %v7266_v16 = vadd.f32 %v5764_v59, %v1189_v13  ;;  %v7268_v17 = vadd.f32 %v1786_v7, %v1190_v15 }
 0x185   : > { %v5648_v18 = vpop.f32.mrb[20].mxu0 }
 0x186   : > { %v1118_v20 = vpop.f32.mrb[21].mxu0  ;;  %v5768_v22 = vpop.f32.mrb[20].mxu1  ;;  %v1179_v29 = vrot.slane %v5648_v18, 7 }
 0x187   : > { %v1177_v23 = vrot.slane %v1118_v20, 7  ;;  %v5649_v25 = vpop.f32.mrb[22].mxu0  ;;  %v1799_v27 = vpop.f32.mrb[21].mxu1 }
 0x188   : > { %v1180_v31 = vrot.slane %v5649_v25, 7  ;;  %v1121_v34 = vpop.f32.mrb[23].mxu0  ;;  %v5769_v10 = vpop.f32.mrb[22].mxu1 }
 0x189   : > { %v1178_v39 = vrot.slane %v1121_v34, 7  ;;  %v1187_v19 = vsel %vm1183_vm0, %v1176_v0, %v1177_v23  ;;  %v1802_v21 = vpop.f32.mrb[23].mxu1  ;;  %v7312_v0 = vld [vmem:[%s8197_s3] ss:$0 sm:$0xff] }
 0x18a   : > { %v1207_v24 = vsel %vm1183_vm0, %v1180_v31, %v1157_v45  ;;  %v7276_v30 = vadd.f32 %v1799_v27, %v1187_v19  ;;  %v1184_v35 = vsel %vm1183_vm0, %v1179_v29, %v1180_v31 }
 0x18b   : > { %v1838_v38 = vadd.f32 %v7189_v40, %v1207_v24  ;;  %v1185_v41 = vsel %vm1183_vm0, %v1178_v39, %v1179_v29  ;;  %v7283_v42 = vadd.f32 %v5769_v10, %v1184_v35  ;;  %v1186_v43 = vsel %vm1183_vm0, %v1177_v23, %v1178_v39  ;;  %v7329_v29 = vld [vmem:[%s8201_s7 + $0x8] sm:$0xff] }
 0x18c   : > { %v7287_v44 = vadd.f32 %v5768_v22, %v1185_v41  ;;  %v7289_v32 = vadd.f32 %v1802_v21, %v1186_v43  ;;  %v7344_v43 = vld [vmem:[%s8201_s7 + $0x10] sm:$0xff] }
 0x1ed   : > { %v5868_v45 = vpop.f32.mrb[24].mxu0 }
 0x1ee   : > { %v7291_v46 = vpop.f32.mrb[25].mxu0  ;;  %v2470_v49 = vrot.slane %v5868_v45, 1 }
 0x1ef   : > { %v5869_v48 = vpop.f32.mrb[26].mxu0  ;;  %v2468_v57 = vrot.slane %v7291_v46, 1 }
 0x1f0   : > { %v2471_v40 = vrot.slane %v5869_v48, 1  ;;  %v2352_v54 = vpop.f32.mrb[27].mxu0 }
 0x1f1   : > { %v2469_v58 = vrot.slane %v2352_v54, 1 }
 0x1f2   : > { %v2513_v59 = vsel %vm2492_vm1, %v2470_v49, %v2471_v40 }
 0x1f3   : > { %v2519_v61 = vadd.f32 %v2513_v59, %v7202_v52  ;;  %v2514_v62 = vsel %vm2492_vm1, %v2469_v58, %v2470_v49  ;;  %v2515_v63 = vsel %vm2492_vm1, %v2468_v57, %v2469_v58 }
 0x1f4   : > { %v2517_v1 = vadd.f32 %v2515_v63, %v1838_v38  ;;  %v2518_v2 = vadd.f32 %v2514_v62, %v7204_v53  ;;  %v7324_v53 = vld [vmem:[%s8201_s7] sm:$0xff] }
 0x1f5   : > { %v2550_v4 = vmul.f32 %v7300_v60, %v2519_v61  ;;  %v5872_v5 = vpop.f32.mrb[28].mxu0 }
 0x1f6   : > { %v2548_v52 = vmul.f32 %v7300_v60, %v2517_v1  ;;  %v2549_v7 = vmul.f32 %v7300_v60, %v2518_v2  ;;  %v2365_v12 = vpop.f32.mrb[29].mxu0  ;;  %v2474_v23 = vrot.slane %v5872_v5, 1  ;;  %v7358_v1 = vld [vmem:[%s8201_s7 + $0x18] sm:$0xff] }
 0x1f7   : > { %v2581_v13 = vadd.f32 %v7312_v0, %v2550_v4  ;;  %v2472_v15 = vrot.slane %v2365_v12, 1  ;;  %v5873_v18 = vpop.f32.mrb[30].mxu0 }
 0x1f8   : > { %v2579_v20 = vadd.f32 %v7312_v0, %v2548_v52  ;;  %v2580_v22 = vadd.f32 %v7312_v0, %v2549_v7  ;;  %v2475_v25 = vrot.slane %v5873_v18, 1  ;;  %v2368_v27 = vpop.f32.mrb[31].mxu0 }
 0x1f9   : > { %v2512_v31 = vsel %vm2492_vm1, %v2471_v40, %v2472_v15  ;;  %v2473_v34 = vrot.slane %v2368_v27, 1  ;;  %v2605_v24 = vmax.f32 %v2581_v13, 0.0 }
 0x1fa   : > { %v2603_v10 = vmax.f32 %v2579_v20, 0.0  ;;  %v2604_v39 = vmax.f32 %v2580_v22, 0.0  ;;  %v2520_v19 = vadd.f32 %v2512_v31, %v7196_v50  ;;  %v2509_v21 = vsel %vm2492_vm1, %v2474_v23, %v2475_v25 }
 0x1fb   : > { %v2523_v35 = vadd.f32 %v2509_v21, %v7218_v8  ;;  %v2510_v38 = vsel %vm2492_vm1, %v2473_v34, %v2474_v23  ;;  %v2511_v41 = vsel %vm2492_vm1, %v2472_v15, %v2473_v34  ;;  %v2633_v63 = vmul.f32 %v7344_v43, %v2605_v24 }
 0x1fc   : > { %v2631_v45 = vmul.f32 %v7324_v53, %v2603_v10  ;;  %v2632_v50 = vmul.f32 %v7329_v29, %v2604_v39  ;;  %v2551_v48 = vmul.f32 %v7300_v60, %v2520_v19  ;;  %v2521_v49 = vadd.f32 %v2511_v41, %v7208_v3 }
 0x1fd   : > { %v2554_v8 = vmul.f32 %v7300_v60, %v2523_v35  ;;  %v2522_v40 = vadd.f32 %v2510_v38, %v7220_v9  ;;  %v5876_v54 = vpop.f32.mrb[32].mxu0 }
 0x1fe   : > { %v2655_v58 = vpack.c.bf16 %v2632_v50, %v2631_v45  ;;  %v2582_v59 = vadd.f32 %v7312_v0, %v2551_v48  ;;  %v2552_v61 = vmul.f32 %v7300_v60, %v2521_v49  ;;  %v2381_v62 = vpop.f32.mrb[33].mxu0  ;;  %v2478_v52 = vrot.slane %v5876_v54, 1 }
 0x1ff   : > { %v2553_v3 = vmul.f32 %v7300_v60, %v2522_v40  ;;  %v2476_v2 = vrot.slane %v2381_v62, 1  ;;  %v5877_v4 = vpop.f32.mrb[34].mxu0  ;;  %v2585_v13 = vadd.f32 %v7312_v0, %v2554_v8 }
 0x200   : > { %2667 = vst [vmem:[#allocation2] sm:$0xff] %v2655_v58  ;;  %v2606_v9 = vmax.f32 %v2582_v59, 0.0  ;;  %v2583_v5 = vadd.f32 %v7312_v0, %v2552_v61  ;;  %v2479_v7 = vrot.slane %v5877_v4, 1  ;;  %v2384_v12 = vpop.f32.mrb[35].mxu0 }
 0x201   : > { %v2584_v15 = vadd.f32 %v7312_v0, %v2553_v3  ;;  %v2508_v18 = vsel %vm2492_vm1, %v2475_v25, %v2476_v2  ;;  %v2477_v20 = vrot.slane %v2384_v12, 1  ;;  %v2609_v35 = vmax.f32 %v2585_v13, 0.0 }
 0x202   : > { %v2634_v22 = vmul.f32 %v7358_v1, %v2606_v9  ;;  %v2607_v23 = vmax.f32 %v2583_v5, 0.0  ;;  %v2524_v27 = vadd.f32 %v2508_v18, %v7214_v6  ;;  %v2505_v31 = vsel %vm2492_vm1, %v2478_v52, %v2479_v7 }
 0x203   : > { %v2608_v34 = vmax.f32 %v2584_v15, 0.0  ;;  %v2527_v10 = vadd.f32 %v2505_v31, %v7234_v36  ;;  %v2506_v39 = vsel %vm2492_vm1, %v2477_v20, %v2478_v52  ;;  %v2507_v24 = vsel %vm2492_vm1, %v2476_v2, %v2477_v20 }
 0x204   : > { %v2656_v19 = vpack.c.bf16 %v2634_v22, %v2633_v63  ;;  %v2635_v21 = vmul.f32 %v7324_v53, %v2607_v23  ;;  %v2555_v25 = vmul.f32 %v7300_v60, %v2524_v27  ;;  %v2525_v38 = vadd.f32 %v2507_v24, %v7224_v28 }
 0x205   : > { %v2636_v6 = vmul.f32 %v7329_v29, %v2608_v34  ;;  %v2526_v41 = vadd.f32 %v2506_v39, %v7236_v37  ;;  %v5880_v45 = vpop.f32.mrb[36].mxu0  ;;  %v2558_v50 = vmul.f32 %v7300_v60, %v2527_v10  ;;  %v2637_v37 = vmul.f32 %v7344_v43, %v2609_v35 }
 0x206   : > { %2668 = vst [vmem:[#allocation2 + $0x8] sm:$0xff] %v2656_v19  ;;  %v2586_v36 = vadd.f32 %v7312_v0, %v2555_v25  ;;  %v2397_v48 = vpop.f32.mrb[37].mxu0  ;;  %v2556_v8 = vmul.f32 %v7300_v60, %v2525_v38  ;;  %v2482_v59 = vrot.slane %v5880_v45, 1 }
 0x207   : > { %v2657_v49 = vpack.c.bf16 %v2636_v6, %v2635_v21  ;;  %v2557_v40 = vmul.f32 %v7300_v60, %v2526_v41  ;;  %v5881_v54 = vpop.f32.mrb[38].mxu0  ;;  %v2480_v61 = vrot.slane %v2397_v48, 1  ;;  %v2589_v9 = vadd.f32 %v7312_v0, %v2558_v50 }
 0x208   : > { %v2610_v58 = vmax.f32 %v2586_v36, 0.0  ;;  %v2483_v62 = vrot.slane %v5881_v54, 1  ;;  %v2400_v28 = vpop.f32.mrb[39].mxu0  ;;  %v2587_v63 = vadd.f32 %v7312_v0, %v2556_v8 }
 0x209   : > { %2669 = vst [vmem:[#allocation2 + $0x10] sm:$0xff] %v2657_v49  ;;  %v2588_v3 = vadd.f32 %v7312_v0, %v2557_v40  ;;  %v2481_v2 = vrot.slane %v2400_v28, 1  ;;  %v2504_v5 = vsel %vm2492_vm1, %v2479_v7, %v2480_v61 }
 0x20a   : > { %v2638_v4 = vmul.f32 %v7358_v1, %v2610_v58  ;;  %v2501_v52 = vsel %vm2492_vm1, %v2482_v59, %v2483_v62  ;;  %v2611_v12 = vmax.f32 %v2587_v63, 0.0  ;;  %v2528_v15 = vadd.f32 %v2504_v5, %v7230_v33 }
 0x20b   : > { %v2612_v13 = vmax.f32 %v2588_v3, 0.0  ;;  %v2531_v20 = vadd.f32 %v2501_v52, %v7250_v55  ;;  %v2502_v22 = vsel %vm2492_vm1, %v2481_v2, %v2482_v59  ;;  %v2503_v23 = vsel %vm2492_vm1, %v2480_v61, %v2481_v2 }
 0x20c   : > { %v2658_v18 = vpack.c.bf16 %v2638_v4, %v2637_v37  ;;  %v2639_v27 = vmul.f32 %v7324_v53, %v2611_v12  ;;  %v2559_v31 = vmul.f32 %v7300_v60, %v2528_v15  ;;  %v2529_v34 = vadd.f32 %v2503_v23, %v7240_v47 }
 0x20d   : > { %v2640_v7 = vmul.f32 %v7329_v29, %v2612_v13  ;;  %v5884_v10 = vpop.f32.mrb[40].mxu0  ;;  %v2613_v33 = vmax.f32 %v2589_v9, 0.0  ;;  %v2562_v39 = vmul.f32 %v7300_v60, %v2531_v20  ;;  %v2530_v55 = vadd.f32 %v2502_v22, %v7252_v56 }
 0x20e   : > { %2670 = vst [vmem:[#allocation2 + $0x18] sm:$0xff] %v2658_v18  ;;  %v2413_v19 = vpop.f32.mrb[41].mxu0  ;;  %v2590_v25 = vadd.f32 %v7312_v0, %v2559_v31  ;;  %v2560_v24 = vmul.f32 %v7300_v60, %v2529_v34  ;;  %v2486_v47 = vrot.slane %v5884_v10, 1 }
 0x20f   : > { %v2659_v21 = vpack.c.bf16 %v2640_v7, %v2639_v27  ;;  %v2484_v35 = vrot.slane %v2413_v19, 1  ;;  %v5885_v6 = vpop.f32.mrb[42].mxu0  ;;  %v2593_v38 = vadd.f32 %v7312_v0, %v2562_v39  ;;  %v2561_v41 = vmul.f32 %v7300_v60, %v2530_v55 }
 0x210   : > { %v2487_v45 = vrot.slane %v5885_v6, 1  ;;  %v2416_v36 = vpop.f32.mrb[43].mxu0  ;;  %v2614_v50 = vmax.f32 %v2590_v25, 0.0  ;;  %v2591_v48 = vadd.f32 %v7312_v0, %v2560_v24  ;;  %v2641_v8 = vmul.f32 %v7344_v43, %v2613_v33 }
 0x211   : > { %2671 = vst [vmem:[#allocation2 + $0x20] sm:$0xff] %v2659_v21  ;;  %v2500_v56 = vsel %vm2492_vm1, %v2483_v62, %v2484_v35  ;;  %v2485_v49 = vrot.slane %v2416_v36, 1  ;;  %v2592_v40 = vadd.f32 %v7312_v0, %v2561_v41  ;;  %v2617_v63 = vmax.f32 %v2593_v38, 0.0 }
 0x212   : > { %v2532_v54 = vadd.f32 %v2500_v56, %v7246_v51  ;;  %v2497_v58 = vsel %vm2492_vm1, %v2486_v47, %v2487_v45  ;;  %v2642_v59 = vmul.f32 %v7358_v1, %v2614_v50  ;;  %v2615_v61 = vmax.f32 %v2591_v48, 0.0 }
 0x213   : > { %v2535_v28 = vadd.f32 %v2497_v58, %v7266_v16  ;;  %v2498_v37 = vsel %vm2492_vm1, %v2485_v49, %v2486_v47  ;;  %v2616_v62 = vmax.f32 %v2592_v40, 0.0  ;;  %v2499_v2 = vsel %vm2492_vm1, %v2484_v35, %v2485_v49 }
 0x214   : > { %v2563_v3 = vmul.f32 %v7300_v60, %v2532_v54  ;;  %v2660_v4 = vpack.c.bf16 %v2642_v59, %v2641_v8  ;;  %v2643_v51 = vmul.f32 %v7324_v53, %v2615_v61  ;;  %v2533_v5 = vadd.f32 %v2499_v2, %v7256_v11 }
 0x215   : > { %v2566_v9 = vmul.f32 %v7300_v60, %v2535_v28  ;;  %v5888_v52 = vpop.f32.mrb[44].mxu0  ;;  %v2644_v16 = vmul.f32 %v7329_v29, %v2616_v62  ;;  %v2534_v13 = vadd.f32 %v2498_v37, %v7268_v17  ;;  %v2645_v33 = vmul.f32 %v7344_v43, %v2617_v63 }
 0x216   : > { %v2594_v12 = vadd.f32 %v7312_v0, %v2563_v3  ;;  %v2429_v15 = vpop.f32.mrb[45].mxu0  ;;  %2672 = vst [vmem:[#allocation2 + $0x28] sm:$0xff] %v2660_v4  ;;  %v2564_v20 = vmul.f32 %v7300_v60, %v2533_v5  ;;  %v2490_v22 = vrot.slane %v5888_v52, 1 }
 0x217   : > { %v2597_v18 = vadd.f32 %v7312_v0, %v2566_v9  ;;  %v2488_v23 = vrot.slane %v2429_v15, 1  ;;  %v5889_v27 = vpop.f32.mrb[46].mxu0  ;;  %v2661_v7 = vpack.c.bf16 %v2644_v16, %v2643_v51  ;;  %v2565_v11 = vmul.f32 %v7300_v60, %v2534_v13 }
 0x218   : > { %v2618_v31 = vmax.f32 %v2594_v12, 0.0  ;;  %v2491_v34 = vrot.slane %v5889_v27, 1  ;;  %v2432_v10 = vpop.f32.mrb[47].mxu0  ;;  %v2595_v39 = vadd.f32 %v7312_v0, %v2564_v20 }
 0x219   : > { %v2496_v17 = vsel %vm2492_vm1, %v2487_v45, %v2488_v23  ;;  %v2489_v55 = vrot.slane %v2432_v10, 1  ;;  %2673 = vst [vmem:[#allocation2 + $0x30] sm:$0xff] %v2661_v7  ;;  %v2596_v21 = vadd.f32 %v7312_v0, %v2565_v11  ;;  %v2621_v35 = vmax.f32 %v2597_v18, 0.0 }
 0x21a   : > { %v2646_v19 = vmul.f32 %v7358_v1, %v2618_v31  ;;  %v2536_v25 = vadd.f32 %v2496_v17, %v7262_v14  ;;  %v2493_v24 = vsel %vm2492_vm1, %v2490_v22, %v2491_v34  ;;  %v2619_v6 = vmax.f32 %v2595_v39, 0.0 }
 0x21b   : > { %v2516_v38 = vsel %vm2492_vm1, %v2491_v34, %v2468_v57  ;;  %v2539_v41 = vadd.f32 %v2493_v24, %v7287_v44  ;;  %v2620_v45 = vmax.f32 %v2596_v21, 0.0  ;;  %v2494_v56 = vsel %vm2492_vm1, %v2489_v55, %v2490_v22 }
 0x21c   : > { %v2662_v47 = vpack.c.bf16 %v2646_v19, %v2645_v33  ;;  %v2567_v36 = vmul.f32 %v7300_v60, %v2536_v25  ;;  %v2540_v50 = vadd.f32 %v2516_v38, %v7283_v42  ;;  %v2647_v14 = vmul.f32 %v7324_v53, %v2619_v6 }
 0x21d   : > { %v2570_v48 = vmul.f32 %v7300_v60, %v2539_v41  ;;  %v2495_v46 = vsel %vm2492_vm1, %v2488_v23, %v2489_v55  ;;  %v2648_v57 = vmul.f32 %v7329_v29, %v2620_v45  ;;  %v2538_v40 = vadd.f32 %v2494_v56, %v7289_v32 }
 0x21e   : > { %2674 = vst [vmem:[#allocation2 + $0x38] sm:$0xff] %v2662_v47  ;;  %v2598_v44 = vadd.f32 %v7312_v0, %v2567_v36  ;;  %v2571_v49 = vmul.f32 %v7300_v60, %v2540_v50  ;;  %v2537_v8 = vadd.f32 %v2495_v46, %v7276_v30  ;;  %v2649_v63 = vmul.f32 %v7344_v43, %v2621_v35 }
 0x21f   : > { %v2601_v42 = vadd.f32 %v7312_v0, %v2570_v48  ;;  %v2663_v54 = vpack.c.bf16 %v2648_v57, %v2647_v14  ;;  %v2569_v37 = vmul.f32 %v7300_v60, %v2538_v40 }
 0x220   : > { %v2622_v58 = vmax.f32 %v2598_v44, 0.0  ;;  %v2602_v59 = vadd.f32 %v7312_v0, %v2571_v49  ;;  %v2568_v61 = vmul.f32 %v7300_v60, %v2537_v8 }
 0x221   : > { %v2625_v28 = vmax.f32 %v2601_v42, 0.0  ;;  %2675 = vst [vmem:[#allocation2 + $0x40] sm:$0xff] %v2663_v54  ;;  %v2600_v32 = vadd.f32 %v7312_v0, %v2569_v37 }
 0x222   : > { %v2650_v62 = vmul.f32 %v7358_v1, %v2622_v58  ;;  %v2626_v3 = vmax.f32 %v2602_v59, 0.0  ;;  %v2599_v30 = vadd.f32 %v7312_v0, %v2568_v61 }
 0x223   : > { %v2653_v2 = vmul.f32 %v7344_v43, %v2625_v28  ;;  %v2624_v5 = vmax.f32 %v2600_v32, 0.0  ;;  %v6686_v43 = vmov (!%p4881_p8), 0  }
 0x224   : > { %v2664_v4 = vpack.c.bf16 %v2650_v62, %v2649_v63  ;;  %v2654_v51 = vmul.f32 %v7358_v1, %v2626_v3  ;;  %v2623_v9 = vmax.f32 %v2599_v30, 0.0  ;;  %2682 = sbr.rel (%p4881_p8) target bundleno = 555 (0x22b), region = 56  ;;  %2683 = vst [vmem:[#allocation2] sm:$0xff] (!%p4881_p8), %v6686_v43  ;;  %2684 = vst [vmem:[#allocation2 + $0x8] sm:$0xff] (!%p4881_p8), %v6686_v43 }
 0x225   : > { %v2652_v16 = vmul.f32 %v7329_v29, %v2624_v5 }
 0x226   : > { %2676 = vst [vmem:[#allocation2 + $0x48] sm:$0xff] %v2664_v4  ;;  %v2666_v52 = vpack.c.bf16 %v2654_v51, %v2653_v2  ;;  %v2651_v60 = vmul.f32 %v7324_v53, %v2623_v9 }
 0x228   : > { %2678 = vst [vmem:[#allocation2 + $0x58] sm:$0xff] %v2666_v52  ;;  %v2665_v12 = vpack.c.bf16 %v2652_v16, %v2651_v60 }
 0x22a   : > { %2677 = vst [vmem:[#allocation2 + $0x50] sm:$0xff] %v2665_v12 }
 0x22b PF: > { %p4882_p9 = scmp.ne.s32.totalorder %s6668_s27, 3 }
 0x22c   : > { %v6687_v0 = vmov (!%p4882_p9), 0  }
 0x22d   : > { %2688 = sbr.rel (%p4882_p9) target bundleno = 564 (0x234), region = 60  ;;  %2689 = vst [vmem:[#allocation2 + $0x50] sm:$0xff] (!%p4882_p9), %v6687_v0  ;;  %2690 = vst [vmem:[#allocation2 + $0x58] sm:$0xff] (!%p4882_p9), %v6687_v0 }
 0x234 PF: > { %v6574_v53 = vld [vmem:[%s8198_s4 + $0xc0] sm:$0xff]   ;;  %v6575_v29 = vld [vmem:[%s8198_s4 + $0xc8] sm:$0xff]   ;;  %v6576_v1 = vld [vmem:[%s8198_s4 + $0xd0] sm:$0xff]   ;;  %vm4294_vm2 = vcmp.lt.s32.totalorder %v7184_v26, 6 }
 0x235   : > { %5890 = vmatprep.subr.bf16.mxu1 %v6574_v53  ;;  %v6577_v13 = vld [vmem:[%s8198_s4 + $0xd8] sm:$0xff]   ;;  %v7486_v15 = vld [vmem:[#allocation2 + $0x10] sm:$0xff]  ;;  %v6578_v18 = vld [vmem:[%s8198_s4 + $0xe0] sm:$0xff]  }
 0x236   : > { %5891 = vmatpush3.bf16.msra.mxu1 %v6574_v53  ;;  %5906 = vmatprep.mubr.bf16.mxu1 %v7486_v15  ;;  %v6579_v20 = vld [vmem:[%s8198_s4 + $0xe8] sm:$0xff]   ;;  %v6580_v22 = vld [vmem:[%s8198_s4 + $0xf0] sm:$0xff]   ;;  %v6581_v23 = vld [vmem:[%s8198_s4 + $0xf8] sm:$0xff]  }
 0x237   : > { %5892 = vmatprep.subr.bf16.mxu1 %v6575_v29  ;;  %6098 = vmatprep.mubr.bf16.mxu0 %v7486_v15  ;;  %v6595_v27 = vld [vmem:[%s8198_s4 + $0x140] sm:$0xff]   ;;  %v6597_v7 = vld [vmem:[%s8198_s4 + $0x148] sm:$0xff]   ;;  %v6599_v11 = vld [vmem:[%s8198_s4 + $0x150] sm:$0xff]  }
 0x238   : > { %6082 = vmatprep.subr.bf16.mxu0 %v6595_v27  ;;  %v6582_v31 = vld [vmem:[%s8198_s4] sm:$0xff]   ;;  %v7514_v34 = vld [vmem:[#allocation2 + $0x18] sm:$0xff]  ;;  %v6583_v10 = vld [vmem:[%s8198_s4 + $0x8] sm:$0xff]  }
 0x239   : > { %6083 = vmatpush3.bf16.msra.mxu0 %v6595_v27  ;;  %v7519_v33 = vld [vmem:[#allocation2 + $0x20] sm:$0xff]  ;;  %v6601_v39 = vld [vmem:[%s8198_s4 + $0x158] sm:$0xff]   ;;  %v6584_v17 = vld [vmem:[%s8198_s4 + $0x10] sm:$0xff]  }
 0x23a   : > { %5893 = vmatpush3.bf16.msra.mxu1 %v6575_v29  ;;  %6084 = vmatprep.subr.bf16.mxu0 %v6597_v7  ;;  %v6603_v55 = vld [vmem:[%s8198_s4 + $0x160] sm:$0xff]   ;;  %v7532_v19 = vld [vmem:[#allocation2 + $0x28] sm:$0xff]  ;;  %v6585_v21 = vld [vmem:[%s8198_s4 + $0x18] sm:$0xff]  }
 0x23b   : > { %5894 = vmatprep.subr.bf16.mxu1 %v6576_v1  ;;  %v7537_v25 = vld [vmem:[#allocation2 + $0x30] sm:$0xff]  ;;  %v6605_v24 = vld [vmem:[%s8198_s4 + $0x168] sm:$0xff]   ;;  %v6586_v35 = vld [vmem:[%s8198_s4 + $0x20] sm:$0xff]  }
 0x23c   : > { %v6607_v6 = vld [vmem:[%s8198_s4 + $0x170] sm:$0xff]   ;;  %v7550_v38 = vld [vmem:[#allocation2 + $0x38] sm:$0xff]  ;;  %v6587_v41 = vld [vmem:[%s8198_s4 + $0x28] sm:$0xff]  }
 0x23d   : > { %6085 = vmatpush3.bf16.msra.mxu0 %v6597_v7  ;;  %v7555_v47 = vld [vmem:[#allocation2 + $0x40] sm:$0xff]  ;;  %v6609_v45 = vld [vmem:[%s8198_s4 + $0x178] sm:$0xff]   ;;  %v6588_v36 = vld [vmem:[%s8198_s4 + $0x30] sm:$0xff]  }
 0x23e   : > { %5895 = vmatpush3.bf16.msra.mxu1 %v6576_v1  ;;  %6086 = vmatprep.subr.bf16.mxu0 %v6599_v11  ;;  %v6611_v50 = vld [vmem:[%s8198_s4 + $0x80] sm:$0xff]   ;;  %v7568_v14 = vld [vmem:[#allocation2 + $0x48] sm:$0xff]  ;;  %v6589_v48 = vld [vmem:[%s8198_s4 + $0x38] sm:$0xff]  }
 0x23f   : > { %5896 = vmatprep.subr.bf16.mxu1 %v6577_v13  ;;  %v7573_v56 = vld [vmem:[#allocation2] sm:$0xff]  ;;  %v6613_v46 = vld [vmem:[%s8198_s4 + $0x88] sm:$0xff]   ;;  %v6615_v44 = vld [vmem:[%s8198_s4 + $0x90] sm:$0xff]  }
 0x240   : > { %v6590_v57 = vld [vmem:[%s8198_s4 + $0x180] sm:$0xff]   ;;  %v7588_v49 = vld [vmem:[#allocation2 + $0x8] sm:$0xff]  ;;  %v6617_v42 = vld [vmem:[%s8198_s4 + $0x98] sm:$0xff]  }
 0x241   : > { %6087 = vmatpush3.bf16.msra.mxu0 %v6599_v11  ;;  %v6591_v8 = vld [vmem:[%s8198_s4 + $0x188] sm:$0xff]   ;;  %v6592_v40 = vld [vmem:[%s8198_s4 + $0x190] sm:$0xff]   ;;  %v6619_v54 = vld [vmem:[%s8198_s4 + $0xa0] sm:$0xff]  }
 0x242   : > { %5897 = vmatpush3.bf16.msra.mxu1 %v6577_v13  ;;  %6088 = vmatprep.subr.bf16.mxu0 %v6601_v39  ;;  %v6593_v58 = vld [vmem:[%s8198_s4 + $0x198] sm:$0xff]   ;;  %v6621_v59 = vld [vmem:[%s8198_s4 + $0xa8] sm:$0xff]   ;;  %v6594_v61 = vld [vmem:[%s8198_s4 + $0x1a0] sm:$0xff]  }
 0x243   : > { %5898 = vmatprep.subr.bf16.mxu1 %v6578_v18  ;;  %v6623_v28 = vld [vmem:[%s8198_s4 + $0xb0] sm:$0xff]   ;;  %v6596_v37 = vld [vmem:[%s8198_s4 + $0x1a8] sm:$0xff]   ;;  %v6625_v63 = vld [vmem:[%s8198_s4 + $0xb8] sm:$0xff]  }
 0x244   : > { %v6598_v62 = vld [vmem:[%s8198_s4 + $0x1b0] sm:$0xff]   ;;  %v7638_v3 = vld [vmem:[%s8198_s4 + $0x200] sm:$0xff]   ;;  %v6600_v30 = vld [vmem:[%s8198_s4 + $0x1b8] sm:$0xff]  }
 0x245   : > { %6089 = vmatpush3.bf16.msra.mxu0 %v6601_v39  ;;  %v7648_v2 = vld [vmem:[%s8198_s4 + $0x208] sm:$0xff]   ;;  %v6602_v32 = vld [vmem:[%s8198_s4 + $0x100] sm:$0xff]   ;;  %v7661_v4 = vld [vmem:[%s8198_s4 + $0x210] sm:$0xff]  }
 0x246   : > { %5899 = vmatpush3.bf16.msra.mxu1 %v6578_v18  ;;  %6090 = vmatprep.subr.bf16.mxu0 %v6603_v55  ;;  %v6604_v51 = vld [vmem:[%s8198_s4 + $0x108] sm:$0xff]   ;;  %v7672_v9 = vld [vmem:[%s8198_s4 + $0x218] sm:$0xff]   ;;  %v6606_v5 = vld [vmem:[%s8198_s4 + $0x110] sm:$0xff]  }
 0x247   : > { %5900 = vmatprep.subr.bf16.mxu1 %v6579_v20  ;;  %v7685_v52 = vld [vmem:[%s8198_s4 + $0x220] sm:$0xff]   ;;  %v6608_v60 = vld [vmem:[%s8198_s4 + $0x118] sm:$0xff]   ;;  %v7696_v16 = vld [vmem:[%s8198_s4 + $0x228] sm:$0xff]  }
 0x248   : > { %v6610_v12 = vld [vmem:[%s8198_s4 + $0x120] sm:$0xff]   ;;  %v7709_v43 = vld [vmem:[%s8198_s4 + $0x230] sm:$0xff]   ;;  %v6612_v0 = vld [vmem:[%s8198_s4 + $0x128] sm:$0xff]  }
 0x249   : > { %6091 = vmatpush3.bf16.msra.mxu0 %v6603_v55  ;;  %v7714_v53 = vld [vmem:[#allocation2 + $0x50] sm:$0xff]  ;;  %v7722_v29 = vld [vmem:[%s8198_s4 + $0x238] sm:$0xff]   ;;  %v6626_v7 = vld [vmem:[%s8198_s4 + $0x60] sm:$0xff]  }
 0x24a   : > { %5901 = vmatpush3.bf16.msra.mxu1 %v6579_v20  ;;  %6092 = vmatprep.subr.bf16.mxu0 %v6605_v24  ;;  %v6614_v1 = vld [vmem:[%s8198_s4 + $0x130] sm:$0xff]   ;;  %v7732_v13 = vld [vmem:[#allocation2 + $0x58] sm:$0xff]  ;;  %v6618_v20 = vld [vmem:[%s8198_s4 + $0x40] sm:$0xff]  }
 0x24b   : > { %5902 = vmatprep.subr.bf16.mxu1 %v6580_v22  ;;  %v6616_v18 = vld [vmem:[%s8198_s4 + $0x138] sm:$0xff]   ;;  %v6630_v11 = vld [vmem:[%s8198_s4 + $0x70] sm:$0xff]   ;;  %v6634_v39 = vld [vmem:[%s8198_s4 + $0x1c0] sm:$0xff]  }
 0x24c   : > { %v6624_v27 = vld [vmem:[%s8198_s4 + $0x58] sm:$0xff]   ;;  %v6638_v55 = vld [vmem:[%s8198_s4 + $0x1d0] sm:$0xff]  }
 0x24d   : > { %6093 = vmatpush3.bf16.msra.mxu0 %v6605_v24  ;;  %v6643_v24 = vld [vmem:[%s8198_s4 + $0x1e8] sm:$0xff]  }
 0x24e   : > { %5903 = vmatpush3.bf16.msra.mxu1 %v6580_v22  ;;  %6094 = vmatprep.subr.bf16.mxu0 %v6607_v6  ;;  %v6620_v22 = vld [vmem:[%s8198_s4 + $0x48] sm:$0xff]  }
 0x24f   : > { %5904 = vmatprep.subr.bf16.mxu1 %v6581_v23 }
 0x251   : > { %6095 = vmatpush3.bf16.msra.mxu0 %v6607_v6 }
 0x252   : > { %5905 = vmatpush3.bf16.msra.mxu1 %v6581_v23  ;;  %6096 = vmatprep.subr.bf16.mxu0 %v6609_v45  ;;  %v6622_v23 = vld [vmem:[%s8198_s4 + $0x50] sm:$0xff]  }
 0x253   : > { %5922 = vmatprep.subr.bf16.mxu1 %v6582_v31 }
 0x255   : > { %5907 = vmatmul.mubr.bf16.vlgmr.msra.gmra.mrb[24].mxu1 %v7514_v34  ;;  %6097 = vmatpush3.bf16.msra.mxu0 %v6609_v45 }
 0x256   : > { %5923 = vmatpush3.bf16.msra.mxu1 %v6582_v31  ;;  %5910 = vmatprep.mubr.bf16.mxu1 %v7519_v33  ;;  %v6628_v31 = vld [vmem:[%s8198_s4 + $0x68] sm:$0xff]  }
 0x257   : > { %5924 = vmatprep.subr.bf16.mxu1 %v6583_v10  ;;  %6114 = vmatprep.subr.bf16.mxu0 %v6611_v50 }
 0x258   : > { %6099 = vmatmul.mubr.bf16.vlgmr.msra.gmra.mrb[48].mxu0 %v7514_v34 }
 0x259   : > { %6115 = vmatpush3.bf16.msra.mxu0 %v6611_v50  ;;  %6102 = vmatprep.mubr.bf16.mxu0 %v7519_v33 }
 0x25a   : > { %5925 = vmatpush3.bf16.msra.mxu1 %v6583_v10  ;;  %6116 = vmatprep.subr.bf16.mxu0 %v6613_v46  ;;  %v6632_v10 = vld [vmem:[%s8198_s4 + $0x78] sm:$0xff]  }
 0x25b   : > { %5926 = vmatprep.subr.bf16.mxu1 %v6584_v17 }
 0x25d   : > { %5911 = vmatmul.mubr.bf16.gmra.mrb[28].mxu1 %v7532_v19  ;;  %6117 = vmatpush3.bf16.msra.mxu0 %v6613_v46 }
 0x25e   : > { %5927 = vmatpush3.bf16.msra.mxu1 %v6584_v17  ;;  %5914 = vmatprep.mubr.bf16.mxu1 %v7537_v25  ;;  %v6636_v17 = vld [vmem:[%s8198_s4 + $0x1c8] sm:$0xff]  }
 0x25f   : > { %5928 = vmatprep.subr.bf16.mxu1 %v6585_v21  ;;  %6118 = vmatprep.subr.bf16.mxu0 %v6615_v44 }
 0x260   : > { %6103 = vmatmul.mubr.bf16.gmra.mrb[52].mxu0 %v7532_v19 }
 0x261   : > { %6119 = vmatpush3.bf16.msra.mxu0 %v6615_v44  ;;  %6106 = vmatprep.mubr.bf16.mxu0 %v7537_v25 }
 0x262   : > { %5929 = vmatpush3.bf16.msra.mxu1 %v6585_v21  ;;  %6120 = vmatprep.subr.bf16.mxu0 %v6617_v42  ;;  %v6640_v21 = vld [vmem:[%s8198_s4 + $0x1d8] sm:$0xff]  }
 0x263   : > { %5930 = vmatprep.subr.bf16.mxu1 %v6586_v35 }
 0x265   : > { %5915 = vmatmul.mubr.bf16.gmra.mrb[32].mxu1 %v7550_v38  ;;  %6121 = vmatpush3.bf16.msra.mxu0 %v6617_v42 }
 0x266   : > { %5931 = vmatpush3.bf16.msra.mxu1 %v6586_v35  ;;  %5918 = vmatprep.mubr.bf16.mxu1 %v7555_v47  ;;  %v6645_v35 = vld [vmem:[%s8198_s4 + $0x1f8] sm:$0xff]  }
 0x267   : > { %5932 = vmatprep.subr.bf16.mxu1 %v6587_v41  ;;  %6122 = vmatprep.subr.bf16.mxu0 %v6619_v54 }
 0x268   : > { %6107 = vmatmul.mubr.bf16.gmra.mrb[56].mxu0 %v7550_v38 }
 0x269   : > { %6123 = vmatpush3.bf16.msra.mxu0 %v6619_v54  ;;  %6110 = vmatprep.mubr.bf16.mxu0 %v7555_v47 }
 0x26a   : > { %5933 = vmatpush3.bf16.msra.mxu1 %v6587_v41  ;;  %6124 = vmatprep.subr.bf16.mxu0 %v6621_v59 }
 0x26b   : > { %5934 = vmatprep.subr.bf16.mxu1 %v6588_v36 }
 0x26d   : > { %5919 = vmatmul.mubr.bf16.gmra.mrb[36].mxu1 %v7568_v14  ;;  %6125 = vmatpush3.bf16.msra.mxu0 %v6621_v59 }
 0x26e   : > { %5935 = vmatpush3.bf16.msra.mxu1 %v6588_v36  ;;  %5938 = vmatprep.mubr.bf16.mxu1 %v7573_v56 }
 0x26f   : > { %5936 = vmatprep.subr.bf16.mxu1 %v6589_v48  ;;  %6126 = vmatprep.subr.bf16.mxu0 %v6623_v28 }
 0x270   : > { %6111 = vmatmul.mubr.bf16.gmra.mrb[60].mxu0 %v7568_v14 }
 0x271   : > { %6127 = vmatpush3.bf16.msra.mxu0 %v6623_v28  ;;  %6130 = vmatprep.mubr.bf16.mxu0 %v7573_v56 }
 0x272   : > { %5937 = vmatpush3.bf16.msra.mxu1 %v6589_v48  ;;  %6128 = vmatprep.subr.bf16.mxu0 %v6625_v63 }
 0x273   : > { %5954 = vmatprep.subr.bf16.mxu1 %v6590_v57 }
 0x275   : > { %5939 = vmatmul.mubr.bf16.vlgmr.msra.gmra.mrb[24].mxu1 %v7588_v49  ;;  %6129 = vmatpush3.bf16.msra.mxu0 %v6625_v63 }
 0x276   : > { %5955 = vmatpush3.bf16.msra.mxu1 %v6590_v57  ;;  %5942 = vmatprep.mubr.bf16.mxu1 %v7486_v15 }
 0x277   : > { %5956 = vmatprep.subr.bf16.mxu1 %v6591_v8  ;;  %6146 = vmatprep.subr.bf16.mxu0 %v7638_v3 }
 0x278   : > { %6131 = vmatmul.mubr.bf16.vlgmr.msra.gmra.mrb[48].mxu0 %v7588_v49 }
 0x279   : > { %6147 = vmatpush3.bf16.msra.mxu0 %v7638_v3  ;;  %6134 = vmatprep.mubr.bf16.mxu0 %v7486_v15 }
 0x27a   : > { %5957 = vmatpush3.bf16.msra.mxu1 %v6591_v8  ;;  %6148 = vmatprep.subr.bf16.mxu0 %v7648_v2 }
 0x27b   : > { %5958 = vmatprep.subr.bf16.mxu1 %v6592_v40 }
 0x27d   : > { %5943 = vmatmul.mubr.bf16.gmra.mrb[28].mxu1 %v7514_v34  ;;  %6149 = vmatpush3.bf16.msra.mxu0 %v7648_v2 }
 0x27e   : > { %5959 = vmatpush3.bf16.msra.mxu1 %v6592_v40  ;;  %5946 = vmatprep.mubr.bf16.mxu1 %v7519_v33 }
 0x27f   : > { %5960 = vmatprep.subr.bf16.mxu1 %v6593_v58  ;;  %6150 = vmatprep.subr.bf16.mxu0 %v7661_v4 }
 0x280   : > { %6135 = vmatmul.mubr.bf16.gmra.mrb[52].mxu0 %v7514_v34 }
 0x281   : > { %6151 = vmatpush3.bf16.msra.mxu0 %v7661_v4  ;;  %6138 = vmatprep.mubr.bf16.mxu0 %v7519_v33 }
 0x282   : > { %5961 = vmatpush3.bf16.msra.mxu1 %v6593_v58  ;;  %6152 = vmatprep.subr.bf16.mxu0 %v7672_v9 }
 0x283   : > { %5962 = vmatprep.subr.bf16.mxu1 %v6594_v61 }
 0x285   : > { %5947 = vmatmul.mubr.bf16.gmra.mrb[32].mxu1 %v7532_v19  ;;  %6153 = vmatpush3.bf16.msra.mxu0 %v7672_v9 }
 0x286   : > { %5963 = vmatpush3.bf16.msra.mxu1 %v6594_v61  ;;  %5950 = vmatprep.mubr.bf16.mxu1 %v7537_v25 }
 0x287   : > { %5964 = vmatprep.subr.bf16.mxu1 %v6596_v37  ;;  %6154 = vmatprep.subr.bf16.mxu0 %v7685_v52 }
 0x288   : > { %6139 = vmatmul.mubr.bf16.gmra.mrb[56].mxu0 %v7532_v19 }
 0x289   : > { %6155 = vmatpush3.bf16.msra.mxu0 %v7685_v52  ;;  %6142 = vmatprep.mubr.bf16.mxu0 %v7537_v25 }
 0x28a   : > { %5965 = vmatpush3.bf16.msra.mxu1 %v6596_v37  ;;  %6156 = vmatprep.subr.bf16.mxu0 %v7696_v16 }
 0x28b   : > { %5966 = vmatprep.subr.bf16.mxu1 %v6598_v62 }
 0x28d   : > { %5951 = vmatmul.mubr.bf16.gmra.mrb[36].mxu1 %v7550_v38  ;;  %6157 = vmatpush3.bf16.msra.mxu0 %v7696_v16 }
 0x28e   : > { %5967 = vmatpush3.bf16.msra.mxu1 %v6598_v62  ;;  %5970 = vmatprep.mubr.bf16.mxu1 %v7519_v33 }
 0x28f   : > { %5968 = vmatprep.subr.bf16.mxu1 %v6600_v30  ;;  %6158 = vmatprep.subr.bf16.mxu0 %v7709_v43 }
 0x290   : > { %6143 = vmatmul.mubr.bf16.gmra.mrb[60].mxu0 %v7550_v38 }
 0x291   : > { %6159 = vmatpush3.bf16.msra.mxu0 %v7709_v43  ;;  %6162 = vmatprep.mubr.bf16.mxu0 %v7519_v33 }
 0x292   : > { %5969 = vmatpush3.bf16.msra.mxu1 %v6600_v30  ;;  %6160 = vmatprep.subr.bf16.mxu0 %v7722_v29 }
 0x293   : > { %5986 = vmatprep.subr.bf16.mxu1 %v6602_v32 }
 0x295   : > { %5971 = vmatmul.mubr.bf16.vlgmr.msra.gmra.mrb[24].mxu1 %v7532_v19  ;;  %6161 = vmatpush3.bf16.msra.mxu0 %v7722_v29 }
 0x296   : > { %5987 = vmatpush3.bf16.msra.mxu1 %v6602_v32  ;;  %5974 = vmatprep.mubr.bf16.mxu1 %v7537_v25 }
 0x297   : > { %5988 = vmatprep.subr.bf16.mxu1 %v6604_v51 }
 0x298   : > { %6163 = vmatmul.mubr.bf16.vlgmr.msra.gmra.mrb[48].mxu0 %v7532_v19 }
 0x29a   : > { %5989 = vmatpush3.bf16.msra.mxu1 %v6604_v51 }
 0x29b   : > { %5990 = vmatprep.subr.bf16.mxu1 %v6606_v5 }
 0x29d   : > { %5975 = vmatmul.mubr.bf16.gmra.mrb[28].mxu1 %v7550_v38 }
 0x29e   : > { %5991 = vmatpush3.bf16.msra.mxu1 %v6606_v5  ;;  %5978 = vmatprep.mubr.bf16.mxu1 %v7555_v47 }
 0x29f   : > { %5992 = vmatprep.subr.bf16.mxu1 %v6608_v60 }
 0x2a2   : > { %5993 = vmatpush3.bf16.msra.mxu1 %v6608_v60 }
 0x2a3   : > { %5994 = vmatprep.subr.bf16.mxu1 %v6610_v12 }
 0x2a5   : > { %5979 = vmatmul.mubr.bf16.gmra.mrb[32].mxu1 %v7568_v14 }
 0x2a6   : > { %5995 = vmatpush3.bf16.msra.mxu1 %v6610_v12  ;;  %5982 = vmatprep.mubr.bf16.mxu1 %v7714_v53 }
 0x2a7   : > { %5996 = vmatprep.subr.bf16.mxu1 %v6612_v0 }
 0x2aa   : > { %5997 = vmatpush3.bf16.msra.mxu1 %v6612_v0  ;;  %v7904_v0 = vld [vmem:[%s6802_s24 + $0x28] sm:$0xff]  }
 0x2ab   : > { %5998 = vmatprep.subr.bf16.mxu1 %v6614_v1 }
 0x2ad   : > { %5983 = vmatmul.mubr.bf16.gmra.mrb[36].mxu1 %v7732_v13 }
 0x2ae   : > { %5999 = vmatpush3.bf16.msra.mxu1 %v6614_v1  ;;  %6002 = vmatprep.mubr.bf16.mxu1 %v7486_v15 }
 0x2af   : > { %6000 = vmatprep.subr.bf16.mxu1 %v6616_v18 }
 0x2b2   : > { %6001 = vmatpush3.bf16.msra.mxu1 %v6616_v18 }
 0x2b3   : > { %6018 = vmatprep.subr.bf16.mxu1 %v6618_v20 }
 0x2b5   : > { %6003 = vmatmul.mubr.bf16.vlgmr.msra.gmra.mrb[40].mxu1 %v7514_v34 }
 0x2b6   : > { %6019 = vmatpush3.bf16.msra.mxu1 %v6618_v20  ;;  %6006 = vmatprep.mubr.bf16.mxu1 %v7519_v33 }
 0x2b7   : > { %6020 = vmatprep.subr.bf16.mxu1 %v6620_v22 }
 0x2ba   : > { %6021 = vmatpush3.bf16.msra.mxu1 %v6620_v22  ;;  %v5125_v22 = vunpack.c.l.bf16 %v7904_v0 }
 0x2bb   : > { %6022 = vmatprep.subr.bf16.mxu1 %v6622_v23 }
 0x2bd   : > { %6007 = vmatmul.mubr.bf16.gmra.mrb[44].mxu1 %v7532_v19 }
 0x2be   : > { %6023 = vmatpush3.bf16.msra.mxu1 %v6622_v23  ;;  %6010 = vmatprep.mubr.bf16.mxu1 %v7537_v25 }
 0x2bf   : > { %6024 = vmatprep.subr.bf16.mxu1 %v6624_v27 }
 0x2c2   : > { %6025 = vmatpush3.bf16.msra.mxu1 %v6624_v27 }
 0x2c3   : > { %6026 = vmatprep.subr.bf16.mxu1 %v6626_v7 }
 0x2c5   : > { %6011 = vmatmul.mubr.bf16.gmra.mrb[48].mxu1 %v7550_v38 }
 0x2c6   : > { %6027 = vmatpush3.bf16.msra.mxu1 %v6626_v7  ;;  %6014 = vmatprep.mubr.bf16.mxu1 %v7555_v47 }
 0x2c7   : > { %6028 = vmatprep.subr.bf16.mxu1 %v6628_v31 }
 0x2ca   : > { %6029 = vmatpush3.bf16.msra.mxu1 %v6628_v31 }
 0x2cb   : > { %6030 = vmatprep.subr.bf16.mxu1 %v6630_v11 }
 0x2cd   : > { %6015 = vmatmul.mubr.bf16.gmra.mrb[52].mxu1 %v7568_v14 }
 0x2ce   : > { %6031 = vmatpush3.bf16.msra.mxu1 %v6630_v11  ;;  %6034 = vmatprep.mubr.bf16.mxu1 %v7573_v56 }
 0x2cf   : > { %6032 = vmatprep.subr.bf16.mxu1 %v6632_v10 }
 0x2d2   : > { %6033 = vmatpush3.bf16.msra.mxu1 %v6632_v10 }
 0x2d3   : > { %6050 = vmatprep.subr.bf16.mxu1 %v6634_v39 }
 0x2d5   : > { %6035 = vmatmul.mubr.bf16.vlgmr.msra.gmra.mrb[40].mxu1 %v7588_v49 }
 0x2d6   : > { %6051 = vmatpush3.bf16.msra.mxu1 %v6634_v39  ;;  %6038 = vmatprep.mubr.bf16.mxu1 %v7486_v15  ;;  %v6642_v15 = vld [vmem:[%s8198_s4 + $0x1e0] sm:$0xff]  }
 0x2d7   : > { %6052 = vmatprep.subr.bf16.mxu1 %v6636_v17 }
 0x2da   : > { %6053 = vmatpush3.bf16.msra.mxu1 %v6636_v17 }
 0x2db   : > { %6054 = vmatprep.subr.bf16.mxu1 %v6638_v55 }
 0x2dd   : > { %6039 = vmatmul.mubr.bf16.gmra.mrb[44].mxu1 %v7514_v34  ;;  %v6644_v34 = vld [vmem:[%s8198_s4 + $0x1f0] sm:$0xff]  }
 0x2de   : > { %6055 = vmatpush3.bf16.msra.mxu1 %v6638_v55  ;;  %6042 = vmatprep.mubr.bf16.mxu1 %v7519_v33 }
 0x2df   : > { %6056 = vmatprep.subr.bf16.mxu1 %v6640_v21 }
 0x2e2   : > { %6057 = vmatpush3.bf16.msra.mxu1 %v6640_v21 }
 0x2e3   : > { %6058 = vmatprep.subr.bf16.mxu1 %v6642_v15 }
 0x2e5   : > { %6043 = vmatmul.mubr.bf16.gmra.mrb[48].mxu1 %v7532_v19 }
 0x2e6   : > { %6059 = vmatpush3.bf16.msra.mxu1 %v6642_v15  ;;  %6046 = vmatprep.mubr.bf16.mxu1 %v7537_v25  ;;  %v7922_v15 = vld [vmem:[%s8199_s5] ss:$0 sm:$0xff] }
 0x2e7   : > { %6060 = vmatprep.subr.bf16.mxu1 %v6643_v24 }
 0x2ea   : > { %6061 = vmatpush3.bf16.msra.mxu1 %v6643_v24  ;;  %v7924_v24 = vrot.slane %v5125_v22, 1 }
 0x2eb   : > { %6062 = vmatprep.subr.bf16.mxu1 %v6644_v34 }
 0x2ed   : > { %6047 = vmatmul.mubr.bf16.gmra.mrb[52].mxu1 %v7550_v38 }
 0x2ee   : > { %6063 = vmatpush3.bf16.msra.mxu1 %v6644_v34  ;;  %6066 = vmatprep.mubr.bf16.mxu1 %v7519_v33 }
 0x2ef   : > { %6064 = vmatprep.subr.bf16.mxu1 %v6645_v35 }
 0x2f2   : > { %6065 = vmatpush3.bf16.msra.mxu1 %v6645_v35 }
 0x2f3   : > { %6178 = vmatprep.subr.bf16.mxu1 %v7638_v3 }
 0x2f5   : > { %6067 = vmatmul.mubr.bf16.vlgmr.msra.gmra.mrb[40].mxu1 %v7532_v19 }
 0x2f6   : > { %6186 = vmatpush3.bf16.msra.mxu1 %v7638_v3  ;;  %6070 = vmatprep.mubr.bf16.mxu1 %v7537_v25 }
 0x2f7   : > { %6179 = vmatprep.subr.bf16.mxu1 %v7648_v2 }
 0x2fa   : > { %6187 = vmatpush3.bf16.msra.mxu1 %v7648_v2 }
 0x2fb   : > { %6180 = vmatprep.subr.bf16.mxu1 %v7661_v4 }
 0x2fd   : > { %6071 = vmatmul.mubr.bf16.gmra.mrb[44].mxu1 %v7550_v38 }
 0x2fe   : > { %6188 = vmatpush3.bf16.msra.mxu1 %v7661_v4  ;;  %6074 = vmatprep.mubr.bf16.mxu1 %v7555_v47 }
 0x2ff   : > { %6181 = vmatprep.subr.bf16.mxu1 %v7672_v9 }
 0x302   : > { %6189 = vmatpush3.bf16.msra.mxu1 %v7672_v9 }
 0x303   : > { %6182 = vmatprep.subr.bf16.mxu1 %v7685_v52 }
 0x305   : > { %6075 = vmatmul.mubr.bf16.gmra.mrb[48].mxu1 %v7568_v14 }
 0x306   : > { %6190 = vmatpush3.bf16.msra.mxu1 %v7685_v52  ;;  %6078 = vmatprep.mubr.bf16.mxu1 %v7714_v53 }
 0x307   : > { %6183 = vmatprep.subr.bf16.mxu1 %v7696_v16 }
 0x30a   : > { %6191 = vmatpush3.bf16.msra.mxu1 %v7696_v16 }
 0x30b   : > { %6184 = vmatprep.subr.bf16.mxu1 %v7709_v43 }
 0x30d   : > { %6079 = vmatmul.mubr.bf16.gmra.mrb[52].mxu1 %v7732_v13 }
 0x30e   : > { %6192 = vmatpush3.bf16.msra.mxu1 %v7709_v43  ;;  %6166 = vmatprep.mubr.bf16.mxu1 %v7537_v25 }
 0x30f   : > { %6185 = vmatprep.subr.bf16.mxu1 %v7722_v29 }
 0x312   : > { %6193 = vmatpush3.bf16.msra.mxu1 %v7722_v29 }
 0x315   : > { %6167 = vmatmul.mubr.bf16.vlgmr.msra.gmra.mrb[56].mxu1 %v7550_v38 }
 0x316   : > { %6170 = vmatprep.mubr.bf16.mxu1 %v7555_v47 }
 0x31d   : > { %6171 = vmatmul.mubr.bf16.gmra.mrb[60].mxu1 %v7568_v14 }
 0x31e   : > { %6174 = vmatprep.mubr.bf16.mxu1 %v7714_v53  ;;  %v5191_v53 = vld [vmem:[%s6802_s24 + $0x20] sm:$0xff]  }
 0x31f   : > { %v5122_v27 = vunpack.c.h.bf16 %v5191_v53  ;;  %v5121_v39 = vunpack.c.l.bf16 %v5191_v53 }
 0x321   : > { %v4422_v34 = vrot.slane %v5122_v27, 1 }
 0x325   : > { %6175 = vmatmul.mubr.bf16.gmra.mrb[64].mxu1 %v7732_v13 }
 0x353   : > { %v7836_v41 = vpop.f32.mrb[52].mxu0 }
 0x354   : > { %v7838_v45 = vpop.f32.mrb[53].mxu0 }
 0x355   : > { %v7840_v36 = vpop.f32.mrb[54].mxu0 }
 0x356   : > { %v7842_v38 = vpop.f32.mrb[55].mxu0 }
 0x35b   : > { %v7850_v48 = vpop.f32.mrb[56].mxu0 }
 0x35c   : > { %v7854_v46 = vpop.f32.mrb[57].mxu0 }
 0x35d   : > { %v7856_v57 = vpop.f32.mrb[58].mxu0 }
 0x35e   : > { %v7858_v44 = vpop.f32.mrb[59].mxu0 }
 0x363   : > { %v7866_v40 = vpop.f32.mrb[60].mxu0 }
 0x364   : > { %v7870_v58 = vpop.f32.mrb[61].mxu0 }
 0x365   : > { %v7872_v59 = vpop.f32.mrb[62].mxu0 }
 0x366   : > { %v7874_v61 = vpop.f32.mrb[63].mxu0 }
 0x368   : > { %v5972_v33 = vpop.f32.mrb[24].mxu1 }
 0x369   : > { %v3131_v19 = vpop.f32.mrb[25].mxu1 }
 0x36a   : > { %v7834_v6 = vpop.f32.mrb[26].mxu1 }
 0x36b   : > { %v3134_v25 = vpop.f32.mrb[27].mxu1  ;;  %v6164_v62 = vpop.f32.mrb[48].mxu0 }
 0x36c   : > { %v4280_v30 = vrot.slane %v6164_v62, 2  ;;  %v7884_v2 = vpop.f32.mrb[49].mxu0 }
 0x36d   : > { %v4278_v32 = vrot.slane %v7884_v2, 2  ;;  %v7887_v4 = vpop.f32.mrb[50].mxu0 }
 0x36e   : > { %v4281_v51 = vrot.slane %v7887_v4, 2  ;;  %v4202_v9 = vpop.f32.mrb[51].mxu0 }
 0x36f   : > { %v4279_v5 = vrot.slane %v4202_v9, 2  ;;  %v7929_v9 = vld [vmem:[%s8200_s6] ss:$0 sm:$0xff] }
 0x370   : > { %v7844_v47 = vpop.f32.mrb[28].mxu1  ;;  %v4307_v52 = vsel %vm4294_vm2, %v4280_v30, %v4281_v51 }
 0x371   : > { %v7846_v50 = vpop.f32.mrb[29].mxu1  ;;  %v4308_v60 = vsel %vm4294_vm2, %v4279_v5, %v4280_v30  ;;  %v4309_v16 = vsel %vm4294_vm2, %v4278_v32, %v4279_v5 }
 0x372   : > { %v7848_v14 = vpop.f32.mrb[30].mxu1 }
 0x373   : > { %v7852_v56 = vpop.f32.mrb[31].mxu1 }
 0x378   : > { %v7860_v49 = vpop.f32.mrb[32].mxu1 }
 0x379   : > { %v7862_v8 = vpop.f32.mrb[33].mxu1 }
 0x37a   : > { %v7864_v42 = vpop.f32.mrb[34].mxu1 }
 0x37b   : > { %v7868_v54 = vpop.f32.mrb[35].mxu1 }
 0x380   : > { %v7876_v28 = vpop.f32.mrb[36].mxu1 }
 0x381   : > { %v7878_v37 = vpop.f32.mrb[37].mxu1 }
 0x382   : > { %v7880_v63 = vpop.f32.mrb[38].mxu1 }
 0x383   : > { %v7882_v3 = vpop.f32.mrb[39].mxu1 }
 0x3c8   : > { %v6068_v12 = vpop.f32.mrb[40].mxu1 }
 0x3c9   : > { %v7901_v43 = vpop.f32.mrb[41].mxu1  ;;  %v3730_v1 = vrot.slane %v6068_v12, 1 }
 0x3ca   : > { %v6069_v29 = vpop.f32.mrb[42].mxu1  ;;  %v3728_v20 = vrot.slane %v7901_v43, 1 }
 0x3cb   : > { %v3731_v13 = vrot.slane %v6069_v29, 1  ;;  %v3652_v18 = vpop.f32.mrb[43].mxu1 }
 0x3cc   : > { %v3729_v23 = vrot.slane %v3652_v18, 1 }
 0x3cd   : > { %v3756_v7 = vsel %vm2492_vm1, %v3730_v1, %v3731_v13 }
 0x3ce   : > { %v3762_v31 = vadd.f32 %v5972_v33, %v3756_v7  ;;  %v3757_v11 = vsel %vm2492_vm1, %v3729_v23, %v3730_v1  ;;  %v3758_v10 = vsel %vm2492_vm1, %v3728_v20, %v3729_v23 }
 0x3cf   : > { %v3760_v17 = vadd.f32 %v3758_v10, %v3131_v19  ;;  %v3761_v55 = vadd.f32 %v3757_v11, %v3134_v25  ;;  %v7931_v19 = vrot.slane %v5121_v39, 1 }
 0x3d0   : > { %v7917_v21 = vadd.f32 %v4307_v52, %v3762_v31  ;;  %v6072_v35 = vpop.f32.mrb[44].mxu1 }
 0x3d1   : > { %v4311_v33 = vadd.f32 %v4309_v16, %v3760_v17  ;;  %v4312_v62 = vadd.f32 %v4308_v60, %v3761_v55  ;;  %v3665_v30 = vpop.f32.mrb[45].mxu1  ;;  %v3734_v53 = vrot.slane %v6072_v35, 1  ;;  %v4450_v60 = vsel %vm2492_vm1, %v4422_v34, %v7924_v24 }
 0x3d2   : > { %v3732_v25 = vrot.slane %v3665_v30, 1  ;;  %v6073_v5 = vpop.f32.mrb[46].mxu1  ;;  %v4451_v31 = vsel %vm2492_vm1, %v7931_v19, %v4422_v34 }
 0x3d3   : > { %v4334_v52 = vmul.f32 %v7922_v15, %v4311_v33  ;;  %v4335_v12 = vmul.f32 %v7922_v15, %v4312_v62  ;;  %v3735_v29 = vrot.slane %v6073_v5, 1  ;;  %v3668_v1 = vpop.f32.mrb[47].mxu1  ;;  %v5193_v5 = vld [vmem:[%s6802_s24 + $0x30] sm:$0xff]  }
 0x3d4   : > { %v3755_v16 = vsel %vm2492_vm1, %v3731_v13, %v3732_v25  ;;  %v3733_v18 = vrot.slane %v3668_v1, 1  ;;  %v5194_v1 = vld [vmem:[%s6802_s24 + $0x38] sm:$0xff]  }
 0x3d5   : > { %v4357_v22 = vadd.f32 %v7929_v9, %v4334_v52  ;;  %v4358_v23 = vadd.f32 %v7929_v9, %v4335_v12  ;;  %v7943_v27 = vadd.f32 %v7834_v6, %v3755_v16  ;;  %v3752_v7 = vsel %vm2492_vm1, %v3734_v53, %v3735_v29 }
 0x3d6   : > { %v7951_v11 = vadd.f32 %v7844_v47, %v3752_v7  ;;  %v3753_v13 = vsel %vm2492_vm1, %v3733_v18, %v3734_v53  ;;  %v3754_v10 = vsel %vm2492_vm1, %v3732_v25, %v3733_v18 }
 0x3d7   : > { %v4373_v6 = vmax.f32 %v4357_v22, 0.0  ;;  %v4374_v39 = vmax.f32 %v4358_v23, 0.0  ;;  %v7958_v17 = vadd.f32 %v3754_v10, %v7846_v50  ;;  %v7961_v55 = vadd.f32 %v3753_v13, %v7852_v56 }
 0x3d8   : > { %v6076_v34 = vpop.f32.mrb[48].mxu1  ;;  %v5126_v56 = vunpack.c.h.bf16 %v7904_v0  ;;  %v5129_v22 = vunpack.c.l.bf16 %v5193_v5  ;;  %v5134_v13 = vunpack.c.h.bf16 %v5194_v1 }
 0x3d9   : > { %v4453_v35 = vadd.f32 %v4451_v31, %v4373_v6  ;;  %v4454_v47 = vadd.f32 %v4450_v60, %v4374_v39  ;;  %v3681_v33 = vpop.f32.mrb[49].mxu1  ;;  %v3738_v12 = vrot.slane %v6076_v34, 1  ;;  %v5133_v31 = vunpack.c.l.bf16 %v5194_v1  ;;  %v5195_v6 = vld [vmem:[%s6802_s24 + $0x40] sm:$0xff]  }
 0x3da   : > { %v3736_v62 = vrot.slane %v3681_v33, 1  ;;  %v6077_v30 = vpop.f32.mrb[50].mxu1  ;;  %v4424_v39 = vrot.slane %v5126_v56, 1  ;;  %v4425_v33 = vrot.slane %v5129_v22, 1 }
 0x3db   : > { %v5154_v52 = vpack.c.bf16 %v4454_v47, %v4453_v35  ;;  %v3739_v25 = vrot.slane %v6077_v30, 1  ;;  %v3684_v53 = vpop.f32.mrb[51].mxu1  ;;  %v4427_v30 = vrot.slane %v5133_v31, 1 }
 0x3dc   : > { %v3751_v50 = vsel %vm2492_vm1, %v3735_v29, %v3736_v62  ;;  %v3737_v16 = vrot.slane %v3684_v53, 1 }
 0x3dd   : > { %5155 = vst [vmem:[%s6810_s16] sm:$0xff] %v5154_v52   ;;  %v7970_v60 = vadd.f32 %v7848_v14, %v3751_v50  ;;  %v3748_v18 = vsel %vm2492_vm1, %v3738_v12, %v3739_v25  ;;  %v5130_v52 = vunpack.c.h.bf16 %v5193_v5  ;;  %v4428_v50 = vrot.slane %v5134_v13, 1 }
 0x3de   : > { %v7975_v23 = vadd.f32 %v7860_v49, %v3748_v18  ;;  %v3749_v7 = vsel %vm2492_vm1, %v3737_v16, %v3738_v12  ;;  %v3750_v29 = vsel %vm2492_vm1, %v3736_v62, %v3737_v16  ;;  %v5196_v49 = vld [vmem:[%s6802_s24 + $0x48] sm:$0xff]  }
 0x3df   : > { %v7982_v0 = vadd.f32 %v3750_v29, %v7862_v8  ;;  %v7985_v14 = vadd.f32 %v3749_v7, %v7868_v54  ;;  %v5137_v8 = vunpack.c.l.bf16 %v5195_v6  ;;  %v5141_v1 = vunpack.c.l.bf16 %v5196_v49 }
 0x3e0   : > { %v6080_v10 = vpop.f32.mrb[52].mxu1  ;;  %v5142_v18 = vunpack.c.h.bf16 %v5196_v49  ;;  %v5138_v7 = vunpack.c.h.bf16 %v5195_v6 }
 0x3e1   : > { %v3697_v34 = vpop.f32.mrb[53].mxu1  ;;  %v3742_v12 = vrot.slane %v6080_v10, 1  ;;  %v4429_v6 = vrot.slane %v5137_v8, 1 }
 0x3e2   : > { %v3740_v35 = vrot.slane %v3697_v34, 1  ;;  %v6081_v47 = vpop.f32.mrb[54].mxu1 }
 0x3e3   : > { %v3743_v62 = vrot.slane %v6081_v47, 1  ;;  %v3700_v53 = vpop.f32.mrb[55].mxu1  ;;  %v4431_v47 = vrot.slane %v5141_v1, 1 }
 0x3e4   : > { %v3747_v54 = vsel %vm2492_vm1, %v3739_v25, %v3740_v35  ;;  %v3741_v16 = vrot.slane %v3700_v53, 1 }
 0x3e5   : > { %v7992_v56 = vadd.f32 %v7864_v42, %v3747_v54  ;;  %v3744_v22 = vsel %vm2492_vm1, %v3742_v12, %v3743_v62  ;;  %v3759_v5 = vsel %vm2492_vm1, %v3743_v62, %v3728_v20  ;;  %v4426_v20 = vrot.slane %v5130_v52, 1  ;;  %v5198_v54 = vld [vmem:[%s6802_s24 + $0x58] sm:$0xff]  }
 0x3e6   : > { %v8001_v29 = vadd.f32 %v7876_v28, %v3744_v22  ;;  %v8004_v25 = vadd.f32 %v7880_v63, %v3759_v5  ;;  %v3745_v31 = vsel %vm2492_vm1, %v3741_v16, %v3742_v12  ;;  %v3746_v42 = vsel %vm2492_vm1, %v3740_v35, %v3741_v16  ;;  %v8019_v63 = vld [vmem:[%s6802_s24 + $0x50] sm:$0xff]  }
 0x3e7   : > { %v8011_v13 = vadd.f32 %v3746_v42, %v7878_v37  ;;  %v8014_v43 = vadd.f32 %v3745_v31, %v7882_v3  ;;  %v4336_v28 = vmul.f32 %v7922_v15, %v7917_v21  ;;  %v8022_v35 = vrot.slane %v5142_v18, 1 }
 0x3e8   : > { %v6168_v10 = vpop.f32.mrb[56].mxu1  ;;  %v4430_v37 = vrot.slane %v5138_v7, 1  ;;  %v4449_v3 = vsel %vm2492_vm1, %v7924_v24, %v4424_v39  ;;  %v4448_v21 = vsel %vm2492_vm1, %v4424_v39, %v4425_v33  ;;  %v8032_v62 = vsel %vm2492_vm1, %v4427_v30, %v4428_v50 }
 0x3e9   : > { %v6194_v34 = vadd.f32 %v6168_v10, %v7836_v41  ;;  %v4215_v49 = vpop.f32.mrb[57].mxu1  ;;  %v8037_v8 = vsel %vm2492_vm1, %v4426_v20, %v4427_v30  ;;  %v4447_v24 = vsel %vm2492_vm1, %v4425_v33, %v4426_v20  ;;  %v4359_v39 = vadd.f32 %v7929_v9, %v4336_v28 }
 0x3ea   : > { %v6195_v52 = vadd.f32 %v4215_v49, %v7838_v45  ;;  %v6169_v12 = vpop.f32.mrb[58].mxu1  ;;  %v5145_v45 = vunpack.c.l.bf16 %v8019_v63  ;;  %v8047_v18 = vsel %vm2492_vm1, %v4428_v50, %v4429_v6  ;;  %v8052_v30 = vsel %vm2492_vm1, %v4431_v47, %v8022_v35 }
 0x3eb   : > { %v6196_v41 = vadd.f32 %v6169_v12, %v7840_v36  ;;  %v4218_v53 = vpop.f32.mrb[59].mxu1  ;;  %v4284_v36 = vrot.slane %v6194_v34, 2  ;;  %v8056_v33 = vsel %vm2492_vm1, %v4430_v37, %v4431_v47  ;;  %v5149_v7 = vunpack.c.l.bf16 %v5198_v54 }
 0x3ec   : > { %v4282_v16 = vrot.slane %v6195_v52, 2  ;;  %v6197_v1 = vadd.f32 %v4218_v53, %v7842_v38  ;;  %v5150_v50 = vunpack.c.h.bf16 %v5198_v54  ;;  %v8067_v20 = vsel %vm2492_vm1, %v4429_v6, %v4430_v37 }
 0x3ed   : > { %v4285_v22 = vrot.slane %v6196_v41, 2  ;;  %v8069_v28 = vrot.slane %v5145_v45, 1  ;;  %v4375_v10 = vmax.f32 %v4359_v39, 0.0  ;;  %v8082_v53 = vrot.slane %v5149_v7, 1 }
 0x3ee   : > { %v4306_v38 = vsel %vm4294_vm2, %v4281_v51, %v4282_v16  ;;  %v4283_v5 = vrot.slane %v6197_v1, 2  ;;  %v8084_v45 = vrot.slane %v5150_v50, 1 }
 0x3ef   : > { %v4314_v31 = vadd.f32 %v4306_v38, %v7943_v27  ;;  %v4303_v42 = vsel %vm4294_vm2, %v4284_v36, %v4285_v22  ;;  %v4455_v38 = vadd.f32 %v4449_v3, %v4375_v10 }
 0x3f0   : > { %v4317_v4 = vadd.f32 %v4303_v42, %v7951_v11  ;;  %v4304_v51 = vsel %vm4294_vm2, %v4283_v5, %v4284_v36  ;;  %v4305_v34 = vsel %vm4294_vm2, %v4282_v16, %v4283_v5  ;;  %v6172_v49 = vpop.f32.mrb[60].mxu1 }
 0x3f1   : > { %v4337_v27 = vmul.f32 %v7922_v15, %v4314_v31  ;;  %v4315_v47 = vadd.f32 %v4305_v34, %v7958_v17  ;;  %v4316_v52 = vadd.f32 %v4304_v51, %v7961_v55  ;;  %v6198_v6 = vadd.f32 %v6172_v49, %v7850_v48  ;;  %v4231_v37 = vpop.f32.mrb[61].mxu1 }
 0x3f2   : > { %v4340_v12 = vmul.f32 %v7922_v15, %v4317_v4  ;;  %v6199_v11 = vadd.f32 %v4231_v37, %v7854_v46  ;;  %v6173_v41 = vpop.f32.mrb[62].mxu1  ;;  %v5146_v55 = vunpack.c.h.bf16 %v8019_v63 }
 0x3f3   : > { %v4360_v54 = vadd.f32 %v7929_v9, %v4337_v27  ;;  %v4338_v39 = vmul.f32 %v7922_v15, %v4315_v47  ;;  %v4339_v17 = vmul.f32 %v7922_v15, %v4316_v52  ;;  %v4234_v16 = vpop.f32.mrb[63].mxu1  ;;  %v6200_v36 = vadd.f32 %v6173_v41, %v7856_v57 }
 0x3f4   : > { %v4363_v48 = vadd.f32 %v7929_v9, %v4340_v12  ;;  %v4286_v1 = vrot.slane %v6199_v11, 2  ;;  %v6201_v46 = vadd.f32 %v4234_v16, %v7858_v44  ;;  %v4288_v31 = vrot.slane %v6198_v6, 2 }
 0x3f5   : > { %v4376_v5 = vmax.f32 %v4360_v54, 0.0  ;;  %v4361_v7 = vadd.f32 %v7929_v9, %v4338_v39  ;;  %v4362_v50 = vadd.f32 %v7929_v9, %v4339_v17  ;;  %v4289_v4 = vrot.slane %v6200_v36, 2 }
 0x3f6   : > { %v4302_v42 = vsel %vm4294_vm2, %v4285_v22, %v4286_v1  ;;  %v4287_v51 = vrot.slane %v6201_v46, 2  ;;  %v4379_v57 = vmax.f32 %v4363_v48, 0.0 }
 0x3f7   : > { %v4456_v34 = vadd.f32 %v4448_v21, %v4376_v5  ;;  %v4377_v49 = vmax.f32 %v4361_v7, 0.0  ;;  %v4378_v27 = vmax.f32 %v4362_v50, 0.0  ;;  %v4318_v47 = vadd.f32 %v4302_v42, %v7970_v60 }
 0x3f8   : > { %v4299_v44 = vsel %vm4294_vm2, %v4288_v31, %v4289_v4  ;;  %v4300_v3 = vsel %vm4294_vm2, %v4287_v51, %v4288_v31  ;;  %v4301_v10 = vsel %vm4294_vm2, %v4286_v1, %v4287_v51  ;;  %v6176_v52 = vpop.f32.mrb[64].mxu1  ;;  %v4459_v5 = vadd.f32 %v8032_v62, %v4379_v57 }
 0x3f9   : > { %v5159_v22 = vpack.c.bf16 %v4456_v34, %v4455_v38  ;;  %v4457_v6 = vadd.f32 %v4447_v24, %v4377_v49  ;;  %v4458_v21 = vadd.f32 %v8037_v8, %v4378_v27  ;;  %v4341_v37 = vmul.f32 %v7922_v15, %v4318_v47  ;;  %v4247_v12 = vpop.f32.mrb[65].mxu1 }
 0x3fa   : > { %v4321_v60 = vadd.f32 %v4299_v44, %v7975_v23  ;;  %v4319_v11 = vadd.f32 %v4301_v10, %v7982_v0  ;;  %v4320_v41 = vadd.f32 %v4300_v3, %v7985_v14  ;;  %v6202_v54 = vadd.f32 %v6176_v52, %v7866_v40  ;;  %v6177_v39 = vpop.f32.mrb[66].mxu1 }
 0x3fb   : > { %5199 = vst [vmem:[%s6810_s16 + $0x8] sm:$0xff] %v5159_v22   ;;  %v5164_v17 = vpack.c.bf16 %v4458_v21, %v4457_v6  ;;  %v4364_v16 = vadd.f32 %v7929_v9, %v4341_v37  ;;  %v6203_v24 = vadd.f32 %v4247_v12, %v7870_v58  ;;  %v6204_v8 = vadd.f32 %v6177_v39, %v7872_v59  ;;  %v4250_v48 = vpop.f32.mrb[67].mxu1 }
 0x3fc   : > { %v4344_v1 = vmul.f32 %v7922_v15, %v4321_v60  ;;  %v4342_v23 = vmul.f32 %v7922_v15, %v4319_v11  ;;  %v4343_v0 = vmul.f32 %v7922_v15, %v4320_v41  ;;  %v4292_v36 = vrot.slane %v6202_v54, 2 }
 0x3fd   : > { %5200 = vst [vmem:[%s6810_s16 + $0x10] sm:$0xff] %v5164_v17   ;;  %v4380_v14 = vmax.f32 %v4364_v16, 0.0  ;;  %v4290_v40 = vrot.slane %v6203_v24, 2  ;;  %v4293_v46 = vrot.slane %v6204_v8, 2  ;;  %v6205_v38 = vadd.f32 %v4250_v48, %v7874_v61 }
 0x3fe   : > { %v4367_v58 = vadd.f32 %v7929_v9, %v4344_v1  ;;  %v4365_v59 = vadd.f32 %v7929_v9, %v4342_v23  ;;  %v4366_v7 = vadd.f32 %v7929_v9, %v4343_v0  ;;  %v4437_v6 = vsel %vm2492_vm1, %v8082_v53, %v8084_v45 }
 0x3ff   : > { %v4460_v50 = vadd.f32 %v8047_v18, %v4380_v14  ;;  %v4298_v31 = vsel %vm4294_vm2, %v4289_v4, %v4290_v40  ;;  %v4295_v42 = vsel %vm4294_vm2, %v4292_v36, %v4293_v46  ;;  %v4310_v61 = vsel %vm4294_vm2, %v4293_v46, %v4278_v32 }
 0x400   : > { %v4381_v62 = vmax.f32 %v4365_v59, 0.0  ;;  %v4382_v51 = vmax.f32 %v4366_v7, 0.0  ;;  %v4322_v34 = vadd.f32 %v4298_v31, %v7992_v56  ;;  %v4440_v18 = vsel %vm2492_vm1, %v8022_v35, %v8069_v28 }
 0x401   : > { %v5169_v49 = vpack.c.bf16 %v4460_v50, %v4459_v5  ;;  %v4325_v4 = vadd.f32 %v4295_v42, %v8001_v29  ;;  %v4326_v27 = vadd.f32 %v4310_v61, %v8004_v25  ;;  %v4291_v47 = vrot.slane %v6205_v38, 2 }
 0x402   : > { %v4383_v57 = vmax.f32 %v4367_v58, 0.0  ;;  %v4461_v2 = vadd.f32 %v8067_v20, %v4381_v62  ;;  %v4462_v32 = vadd.f32 %v8056_v33, %v4382_v51  ;;  %v4345_v44 = vmul.f32 %v7922_v15, %v4322_v34 }
 0x403   : > { %5201 = vst [vmem:[%s6810_s16 + $0x18] sm:$0xff] %v5169_v49   ;;  %v4348_v56 = vmul.f32 %v7922_v15, %v4325_v4  ;;  %v4349_v3 = vmul.f32 %v7922_v15, %v4326_v27  ;;  %v4296_v35 = vsel %vm4294_vm2, %v4291_v47, %v4292_v36  ;;  %v4297_v29 = vsel %vm4294_vm2, %v4290_v40, %v4291_v47 }
 0x404   : > { %v5174_v25 = vpack.c.bf16 %v4462_v32, %v4461_v2  ;;  %v4368_v10 = vadd.f32 %v7929_v9, %v4345_v44  ;;  %v4323_v20 = vadd.f32 %v4297_v29, %v8011_v13  ;;  %v4324_v33 = vadd.f32 %v4296_v35, %v8014_v43 }
 0x405   : > { %v4371_v52 = vadd.f32 %v7929_v9, %v4348_v56  ;;  %v4372_v22 = vadd.f32 %v7929_v9, %v4349_v3  ;;  %v4434_v21 = vrot.slane %v5146_v55, 1  ;;  %v4452_v13 = vsel %vm2492_vm1, %v8084_v45, %v7931_v19 }
 0x406   : > { %5202 = vst [vmem:[%s6810_s16 + $0x20] sm:$0xff] %v5174_v25   ;;  %v4384_v37 = vmax.f32 %v4368_v10, 0.0  ;;  %v4346_v43 = vmul.f32 %v7922_v15, %v4323_v20  ;;  %v4347_v12 = vmul.f32 %v7922_v15, %v4324_v33  ;;  %v4463_v41 = vadd.f32 %v8052_v30, %v4383_v57 }
 0x407   : > { %v4387_v60 = vmax.f32 %v4371_v52, 0.0  ;;  %v4388_v11 = vmax.f32 %v4372_v22, 0.0  ;;  %v4438_v19 = vsel %vm2492_vm1, %v4434_v21, %v8082_v53  ;;  %v4439_v15 = vsel %vm2492_vm1, %v8069_v28, %v4434_v21 }
 0x408   : > { %v4464_v54 = vadd.f32 %v4440_v18, %v4384_v37  ;;  %v4369_v63 = vadd.f32 %v7929_v9, %v4346_v43  ;;  %v4370_v55 = vadd.f32 %v7929_v9, %v4347_v12 }
 0x409   : > { %v4467_v39 = vadd.f32 %v4437_v6, %v4387_v60  ;;  %v4468_v17 = vadd.f32 %v4452_v13, %v4388_v11 }
 0x40a   : > { %v5179_v45 = vpack.c.bf16 %v4464_v54, %v4463_v41  ;;  %v4385_v16 = vmax.f32 %v4369_v63, 0.0  ;;  %v4386_v24 = vmax.f32 %v4370_v55, 0.0 }
 0x40b   : > { %v5189_v30 = vpack.c.bf16 %v4468_v17, %v4467_v39 }
 0x40c   : > { %5203 = vst [vmem:[%s6810_s16 + $0x28] sm:$0xff] %v5179_v45   ;;  %v4465_v8 = vadd.f32 %v4439_v15, %v4385_v16  ;;  %v4466_v48 = vadd.f32 %v4438_v19, %v4386_v24 }
 0x40d   : > { %5205 = vst [vmem:[%s6810_s16 + $0x38] sm:$0xff] %v5189_v30  }
 0x40e   : > { %v5184_v1 = vpack.c.bf16 %v4466_v48, %v4465_v8 }
 0x410   : > { %5204 = vst [vmem:[%s6810_s16 + $0x30] sm:$0xff] %v5184_v1  }
 0x411 PF: > { %s18_s9 = sadd.s32 1, %s6684_s9   ;;  %s8203_s27 = smov %s6676_s29 }
 0x412   : > { %p15_p10 = scmp.ge.s32.totalorder %s18_s9, 10   ;;  %s8204_s28 = smov %s6680_s30 }
 0x413   : > { %s8205_s29 = smov %s8208_s10  ;;  %s8206_s30 = smov %s8212_s11 }
 0x414   :  { %17 = sbr.rel (!%p15_p10) target bundleno = 3 (0x3), region = 106 }

</bundles_post_ra>
